<compile_context>
chip_gen: v7x
topology: tpu7x:2x2x1
jax: 0.10.0
libtpu: 0.0.40
codegen_flags: <defaults>
</compile_context>

<pallas_src>
import math

import jax
import jax.numpy as jnp
from jax.experimental import pallas as pl
from jax.experimental.pallas import tpu as pltpu


# ----------------------------- math helpers ----------------------------------

def _erf(x):
    # Abramowitz & Stegun 7.1.26 polynomial approximation of erf,
    # max abs error ~1.5e-7; VPU/EUP-friendly ops only.
    # TODO(synk): switch to jax.lax.erf if/when it lowers in Mosaic.
    a1, a2, a3, a4, a5 = 0.254829592, -0.284496736, 1.421413741, -1.453152027, 1.061405429
    p = 0.3275911
    sgn = jnp.where(x >= 0.0, 1.0, -1.0)
    ax = jnp.abs(x)
    t = 1.0 / (1.0 + p * ax)
    poly = ((((a5 * t + a4) * t + a3) * t + a2) * t + a1) * t
    return sgn * (1.0 - poly * jnp.exp(-ax * ax))


def _gelu_exact(x):
    # matches torch.nn.functional.gelu (approximate='none')
    return 0.5 * x * (1.0 + _erf(x * 0.7071067811865476))


def _layernorm(x, g, b, eps=1e-6):
    mu = jnp.mean(x, axis=-1, keepdims=True)
    var = jnp.mean((x - mu) ** 2, axis=-1, keepdims=True)
    return (x - mu) * jax.lax.rsqrt(var + eps) * g + b


# ------------------------------ fused kernel ----------------------------------

# order of the stacked per-layer parameters as passed to the kernel
_PARAM_ORDER = ["ln1_g", "ln1_b", "wqkv", "bqkv", "wo", "bo",
                "ln2_g", "ln2_b", "w1", "b1", "w2", "b2"]
_MXU_WEIGHTS = ("wqkv", "wo", "w1", "w2")   # castable to bf16 for the MXU


def _make_encoder_kernel(BT, S, H, num_heads, with_weights):
    hd = H // num_heads
    scale = 1.0 / math.sqrt(hd)
    BS = BT * S                     # rows in the resident hidden state
    G = num_heads * BT              # (head, batch) attention groups

    def kernel(x_ref,
               ln1_g, ln1_b, wqkv, bqkv, wo, bo,
               ln2_g, ln2_b, w1, b1, w2, b2,
               enc_g, enc_b,
               out_ref, *rest):
        if with_weights:
            attnw_ref, x_state = rest
        else:
            (x_state,) = rest

        layer = pl.program_id(1)

        # load the batch-tile input once; state stays resident in VMEM
        @pl.when(layer == 0)
        def _():
            x_state[...] = x_ref[...].reshape(BS, H).astype(jnp.float32)

        x2 = x_state[...]                                    # (BS, H) fp32

        # ---------------- attention sub-block (pre-LN, residual) ------------
        xn = _layernorm(x2, ln1_g[0], ln1_b[0])              # (BS, H) fp32

        wqkv_v = wqkv[0]                                     # (H, 3H), f32/bf16
        qkv = jnp.dot(xn.astype(wqkv_v.dtype), wqkv_v,
                      preferred_element_type=jnp.float32) + bqkv[0]   # (BS, 3H)

        def head_group(base):
            # static lane slices per head -> (nh, BS, hd) -> (nh*BT, S, hd)
            parts = [qkv[:, base + n * hd: base + (n + 1) * hd]
                     for n in range(num_heads)]
            return jnp.stack(parts, axis=0).reshape(G, S, hd)

        qg = head_group(0) * scale          # fold 1/sqrt(hd) into q (+ bias)
        kg = head_group(H)
        vg = head_group(2 * H)

        scores = jnp.einsum('gid,gjd->gij', qg, kg,
                            preferred_element_type=jnp.float32)   # (G, S, S)
        scores = scores - jnp.max(scores, axis=-1, keepdims=True)
        e = jnp.exp(scores)
        # exact reciprocal: probs are a checked output at 1e-4 tolerance.
        probs = e * pl.reciprocal(jnp.sum(e, axis=-1, keepdims=True),
                                  approx=False)

        if with_weights:
            # whole-slab store; reordered to torch (B, nh, S, S) in the wrapper
            attnw_ref[...] = probs.reshape(num_heads, BT, S, S)

        ctx = jnp.einsum('gij,gjd->gid', probs, vg,
                         preferred_element_type=jnp.float32)      # (G, S, hd)
        # regroup heads into the lane dim: (nh, BS, hd) -> (BS, H), then one
        # K=H matmul for the output projection (fused head reduction).
        ctx_h = ctx.reshape(num_heads, BS, hd)
        ctx_cat = jnp.concatenate([ctx_h[n] for n in range(num_heads)], axis=-1)
        wo_v = wo[0]
        proj = jnp.dot(ctx_cat.astype(wo_v.dtype), wo_v,
                       preferred_element_type=jnp.float32) + bo[0]
        # TODO(synk): attn_dropout / proj_dropout are identity in eval mode.
        x2 = x2 + proj

        # ------------------- MLP sub-block (pre-LN, residual) ---------------
        xn = _layernorm(x2, ln2_g[0], ln2_b[0])
        w1_v, w2_v = w1[0], w2[0]
        y = jnp.dot(xn.astype(w1_v.dtype), w1_v,
                    preferred_element_type=jnp.float32) + b1[0]
        y = _gelu_exact(y)
        y = jnp.dot(y.astype(w2_v.dtype), w2_v,
                    preferred_element_type=jnp.float32) + b2[0]
        x2 = x2 + y

        x_state[...] = x2

        # fused final encoder_norm on the last layer
        @pl.when(layer == pl.num_programs(1) - 1)
        def _():
            out_ref[...] = _layernorm(x2, enc_g[...], enc_b[...]) \
                .reshape(BT, S, H).astype(out_ref.dtype)

    return kernel


def _layer_spec(p):
    """Block = one layer slice of a (L, ...)-stacked parameter."""
    nd = p.ndim - 1
    return pl.BlockSpec((1,) + tuple(p.shape[1:]),
                        lambda bi, l, _nd=nd: (l,) + (0,) * _nd)


def _const_spec(p):
    """Whole array, same block for every grid step (grid-invariant)."""
    nd = p.ndim
    return pl.BlockSpec(tuple(p.shape), lambda bi, l, _nd=nd: (0,) * _nd)


def _vmem_limit_bytes(params, bt, S, H, mlp_dim, num_heads, vis):
    per_layer_w = sum(math.prod(p.shape[1:]) * p.dtype.itemsize
                      for p in params.values())
    bs, g = bt * S, num_heads * bt
    act = 6 * bs * max(3 * H, mlp_dim) * 4 + 3 * g * S * S * 4
    io = 2 * bs * H * 4 + (2 * g * S * S * 4 if vis else 0)
    est = 2 * per_layer_w + act + io + bs * H * 4
    # clamp to a safe range (v7x physical VMEM is 64 MiB per TensorCore)
    return int(min(100 * 2 ** 20, max(32 * 2 ** 20, 2 * est)))


def encoder_forward(hidden_states, params, enc_g, enc_b, *,
                    num_heads, vis, batch_block=None):
    B, S, H = hidden_states.shape
    L = params["wqkv"].shape[0]
    mlp_dim = params["w1"].shape[-1]
    bt = batch_block or B
    assert B % bt == 0
    nb = B // bt

    kernel = _make_encoder_kernel(bt, S, H, num_heads, vis)

    in_specs = ([pl.BlockSpec((bt, S, H), lambda bi, l: (bi, 0, 0))]
                + [_layer_spec(params[k]) for k in _PARAM_ORDER]
                + [_const_spec(enc_g), _const_spec(enc_b)])

    out_shapes = [jax.ShapeDtypeStruct((B, S, H), hidden_states.dtype)]
    out_specs = [pl.BlockSpec((bt, S, H), lambda bi, l: (bi, 0, 0))]
    if vis:
        # layout (L*nh, B, S, S); per grid step one (nh, bt, S, S) slab
        out_shapes.append(jax.ShapeDtypeStruct((L * num_heads, B, S, S),
                                               jnp.float32))
        out_specs.append(pl.BlockSpec((num_heads, bt, S, S),
                                      lambda bi, l: (l, bi, 0, 0)))

    outs = pl.pallas_call(
        kernel,
        grid=(nb, L),
        in_specs=in_specs,
        out_specs=tuple(out_specs) if vis else out_specs[0],
        out_shape=tuple(out_shapes) if vis else out_shapes[0],
        scratch_shapes=[pltpu.VMEM((bt * S, H), jnp.float32)],  # resident state
        compiler_params=pltpu.CompilerParams(
            # batch tiles independent (megacore-shardable); layers sequential
            dimension_semantics=("parallel", "arbitrary"),
            vmem_limit_bytes=_vmem_limit_bytes(params, bt, S, H, mlp_dim,
                                               num_heads, vis)),
    )(hidden_states, *[params[k] for k in _PARAM_ORDER], enc_g, enc_b)

    if vis:
        encoded, attnw_raw = outs
        attnw = jnp.transpose(
            attnw_raw.reshape(L, num_heads, B, S, S), (0, 2, 1, 3, 4))
        weights = [attnw[i] for i in range(L)]
    else:
        encoded = outs
        weights = []
    return encoded, weights


def cast_matmul_weights(params, dtype):
    """bf16 weight streaming for the MXU matmuls; LN params / biases stay fp32."""
    out = dict(params)
    for k in _MXU_WEIGHTS:
        out[k] = params[k].astype(dtype)
    return out


# ------------------------------- param init ----------------------------------

def _linear_w(key, fan_in, fan_out):
    # PyTorch Linear default: kaiming-uniform ~ U(-1/sqrt(fan_in), 1/sqrt(fan_in))
    bound = 1.0 / math.sqrt(fan_in)
    return jax.random.uniform(key, (fan_in, fan_out), jnp.float32, -bound, bound)


def _xavier_w(key, fan_in, fan_out):
    limit = math.sqrt(6.0 / (fan_in + fan_out))
    return jax.random.uniform(key, (fan_in, fan_out), jnp.float32, -limit, limit)


def init_encoder_params(key, num_layers, hidden, mlp_dim, num_heads):
    bound_h = 1.0 / math.sqrt(hidden)
    per_layer = {k: [] for k in _PARAM_ORDER}
    for _ in range(num_layers):
        key, *ks = jax.random.split(key, 13)
        wq = _linear_w(ks[0], hidden, hidden)
        bq = jax.random.uniform(ks[1], (hidden,), jnp.float32, -bound_h, bound_h)
        wk = _linear_w(ks[2], hidden, hidden)
        bk = jax.random.uniform(ks[3], (hidden,), jnp.float32, -bound_h, bound_h)
        wv = _linear_w(ks[4], hidden, hidden)
        bv = jax.random.uniform(ks[5], (hidden,), jnp.float32, -bound_h, bound_h)
        wo = _linear_w(ks[6], hidden, hidden)
        bo = jax.random.uniform(ks[7], (hidden,), jnp.float32, -bound_h, bound_h)

        per_layer["ln1_g"].append(jnp.ones((1, hidden), jnp.float32))
        per_layer["ln1_b"].append(jnp.zeros((1, hidden), jnp.float32))
        # fused QKV packing: columns = [Wq | Wk | Wv], each head-major
        per_layer["wqkv"].append(jnp.concatenate([wq, wk, wv], axis=1))
        per_layer["bqkv"].append(jnp.concatenate([bq, bk, bv]).reshape(1, 3 * hidden))
        per_layer["wo"].append(wo)
        per_layer["bo"].append(bo.reshape(1, hidden))
        per_layer["ln2_g"].append(jnp.ones((1, hidden), jnp.float32))
        per_layer["ln2_b"].append(jnp.zeros((1, hidden), jnp.float32))
        per_layer["w1"].append(_xavier_w(ks[8], hidden, mlp_dim))
        per_layer["b1"].append(1e-6 * jax.random.normal(ks[9], (1, mlp_dim), jnp.float32))
        per_layer["w2"].append(_xavier_w(ks[10], mlp_dim, hidden))
        per_layer["b2"].append(1e-6 * jax.random.normal(ks[11], (1, hidden), jnp.float32))

    params = {k: jnp.stack(v, axis=0) for k, v in per_layer.items()}
    enc_g = jnp.ones((1, hidden), jnp.float32)
    enc_b = jnp.zeros((1, hidden), jnp.float32)
    return params, enc_g, enc_b


# ---------------------------- pure-JAX reference ------------------------------

def encoder_reference(x, params, enc_g, enc_b, *, num_heads):
    # NOTE: uses the same _gelu_exact polynomial as the kernel (so the erf
    # approximation itself is not validated against torch's exact erf here).
    B, S, H = x.shape
    L = params["wqkv"].shape[0]
    hd = H // num_heads
    scale = 1.0 / math.sqrt(hd)
    f32 = jnp.float32
    weights = []
    for l in range(L):
        wqkv = params["wqkv"][l].astype(f32)
        bqkv = params["bqkv"][l].reshape(3 * H)
        wo = params["wo"][l].astype(f32)
        bo = params["bo"][l].reshape(H)
        w1 = params["w1"][l].astype(f32)
        b1 = params["b1"][l]
        w2 = params["w2"][l].astype(f32)
        b2 = params["b2"][l]

        res = x
        xn = _layernorm(x, params["ln1_g"][l], params["ln1_b"][l])
        qkv = jnp.einsum('bsk,kd->bsd', xn, wqkv) + bqkv
        q, k, v = qkv[..., :H], qkv[..., H:2 * H], qkv[..., 2 * H:]
        qh = q.reshape(B, S, num_heads, hd).transpose(0, 2, 1, 3)
        kh = k.reshape(B, S, num_heads, hd).transpose(0, 2, 1, 3)
        vh = v.reshape(B, S, num_heads, hd).transpose(0, 2, 1, 3)
        scores = jnp.einsum('bhid,bhjd->bhij', qh, kh) * scale
        probs = jax.nn.softmax(scores, axis=-1)
        weights.append(probs)
        ctx = jnp.einsum('bhij,bhjd->bhid', probs, vh)
        ctx = ctx.transpose(0, 2, 1, 3).reshape(B, S, H)
        x = res + jnp.einsum('bsk,kd->bsd', ctx, wo) + bo

        res = x
        xn = _layernorm(x, params["ln2_g"][l], params["ln2_b"][l])
        y = jnp.einsum('bsk,kd->bsd', xn, w1) + b1
        y = _gelu_exact(y)
        y = jnp.einsum('bsk,kd->bsd', y, w2) + b2
        x = res + y
    return _layernorm(x, enc_g, enc_b), weights


# ---------------------------------- main --------------------------------------

if __name__ == "__main__":
    # Encoder(vis=True, hidden_size=32, num_layers=2, mlp_dim=64, num_heads=4,
    #         dropout_rate=0.1, attention_dropout_rate=0.1)  -- eval mode
    B, S = 2, 8
    HIDDEN, NUM_LAYERS, MLP_DIM, NUM_HEADS = 32, 2, 64, 4
    VIS = True

    key = jax.random.PRNGKey(0)
    key, xkey = jax.random.split(key)
    hidden_states = jax.random.normal(xkey, (B, S, HIDDEN), jnp.float32)

    params, enc_g, enc_b = init_encoder_params(key, NUM_LAYERS, HIDDEN, MLP_DIM, NUM_HEADS)

    # --- fp32 weights (bit-comparable to the torch module) -------------------
    encoded, attn_weights = encoder_forward(
        hidden_states, params, enc_g, enc_b,
        num_heads=NUM_HEADS, vis=VIS, batch_block=1)
    encoded = jax.block_until_ready(encoded)
    for w in attn_weights:
        jax.block_until_ready(w)

    assert encoded.shape == (B, S, HIDDEN)
    assert len(attn_weights) == NUM_LAYERS
    assert all(w.shape == (B, NUM_HEADS, S, S) for w in attn_weights)

    ref_encoded, ref_weights = encoder_reference(
        hidden_states, params, enc_g, enc_b, num_heads=NUM_HEADS)
    err = float(jnp.max(jnp.abs(encoded - ref_encoded)))
    assert err < 1e-4, f"encoded mismatch: max abs err {err}"
    for w, rw in zip(attn_weights, ref_weights):
        werr = float(jnp.max(jnp.abs(w - rw)))
        assert werr < 1e-4, f"attention weights mismatch: max abs err {werr}"

    # --- bf16 weight streaming (production MXU setting, loose tolerance) -----
    params_bf16 = cast_matmul_weights(params, jnp.bfloat16)
    encoded_bf, attn_bf = encoder_forward(
        hidden_states, params_bf16, enc_g, enc_b,
        num_heads=NUM_HEADS, vis=VIS, batch_block=1)
    encoded_bf = jax.block_until_ready(encoded_bf)
    err_bf = float(jnp.max(jnp.abs(encoded_bf - ref_encoded)))
    assert err_bf < 5e-2, f"bf16 encoded mismatch: max abs err {err_bf}"
    for w, rw in zip(attn_bf, ref_weights):
        werr = float(jnp.max(jnp.abs(w - rw)))
        assert werr < 3e-2, f"bf16 attention weights mismatch: max abs err {werr}"

    print("KERNEL_OK")
</pallas_src>

<mosaic_0001>
module attributes {stable_mosaic.version = 11 : i64} {
  func.func @kernel(%arg0: i32, %arg1: i32, %arg2: memref<1x8x32xf32, #tpu.memory_space<vmem>>, %arg3: memref<1x1x32xf32, #tpu.memory_space<vmem>>, %arg4: memref<1x1x32xf32, #tpu.memory_space<vmem>>, %arg5: memref<1x32x96xf32, #tpu.memory_space<vmem>>, %arg6: memref<1x1x96xf32, #tpu.memory_space<vmem>>, %arg7: memref<1x32x32xf32, #tpu.memory_space<vmem>>, %arg8: memref<1x1x32xf32, #tpu.memory_space<vmem>>, %arg9: memref<1x1x32xf32, #tpu.memory_space<vmem>>, %arg10: memref<1x1x32xf32, #tpu.memory_space<vmem>>, %arg11: memref<1x32x64xf32, #tpu.memory_space<vmem>>, %arg12: memref<1x1x64xf32, #tpu.memory_space<vmem>>, %arg13: memref<1x64x32xf32, #tpu.memory_space<vmem>>, %arg14: memref<1x1x32xf32, #tpu.memory_space<vmem>>, %arg15: memref<1x32xf32, #tpu.memory_space<vmem>>, %arg16: memref<1x32xf32, #tpu.memory_space<vmem>>, %arg17: memref<1x8x32xf32, #tpu.memory_space<vmem>>, %arg18: memref<4x1x8x8xf32, #tpu.memory_space<vmem>>, %arg19: memref<8x32xf32, #tpu.memory_space<vmem>>) attributes {dimension_semantics = [#tpu.dimension_semantics<parallel>, #tpu.dimension_semantics<arbitrary>], iteration_bounds = array<i64: 2, 2>, scalar_prefetch = 0 : i64, scratch_operands = 1 : i64, tpu.core_type = #tpu.core_type<tc>, window_params = [{transform_indices = @transform_0, window_bounds = array<i64: 1, 8, 32>}, {transform_indices = @transform_1, window_bounds = array<i64: 1, 1, 32>}, {transform_indices = @transform_2, window_bounds = array<i64: 1, 1, 32>}, {transform_indices = @transform_3, window_bounds = array<i64: 1, 32, 96>}, {transform_indices = @transform_4, window_bounds = array<i64: 1, 1, 96>}, {transform_indices = @transform_5, window_bounds = array<i64: 1, 32, 32>}, {transform_indices = @transform_6, window_bounds = array<i64: 1, 1, 32>}, {transform_indices = @transform_7, window_bounds = array<i64: 1, 1, 32>}, {transform_indices = @transform_8, window_bounds = array<i64: 1, 1, 32>}, {transform_indices = @transform_9, window_bounds = array<i64: 1, 32, 64>}, {transform_indices = @transform_10, window_bounds = array<i64: 1, 1, 64>}, {transform_indices = @transform_11, window_bounds = array<i64: 1, 64, 32>}, {transform_indices = @transform_12, window_bounds = array<i64: 1, 1, 32>}, {pipeline_mode = #tpu.pipeline_mode<synchronous>, transform_indices = @transform_13, window_bounds = array<i64: 1, 32>}, {pipeline_mode = #tpu.pipeline_mode<synchronous>, transform_indices = @transform_14, window_bounds = array<i64: 1, 32>}, {transform_indices = @transform_15, window_bounds = array<i64: 1, 8, 32>}, {transform_indices = @transform_16, window_bounds = array<i64: 4, 1, 8, 8>}]} {
    %c0_i32 = arith.constant 0 : i32
    %0 = arith.cmpi eq, %arg1, %c0_i32 : i32
    %1 = arith.extui %0 : i1 to i32
    %c0_i32_0 = arith.constant 0 : i32
    %2 = arith.cmpi ne, %1, %c0_i32_0 : i32
    scf.if %2 {
      %c0_79 = arith.constant 0 : index
      %c0_80 = arith.constant 0 : index
      %c0_81 = arith.constant 0 : index
      %183 = vector.load %arg2[%c0_79, %c0_80, %c0_81] : memref<1x8x32xf32, #tpu.memory_space<vmem>>, vector<1x8x32xf32>
      %184 = vector.shape_cast %183 : vector<1x8x32xf32> to vector<8x32xf32>
      %c0_82 = arith.constant 0 : index
      %c0_83 = arith.constant 0 : index
      %185 = vector.load %arg19[%c0_82, %c0_83] : memref<8x32xf32, #tpu.memory_space<vmem>>, vector<8x32xf32>
      tpu.vector_store %arg19[%c0_82, %c0_83], %184 {strides = array<i32>} : memref<8x32xf32, #tpu.memory_space<vmem>>, vector<8x32xf32>,
    } else {
    }
    %c0 = arith.constant 0 : index
    %c0_1 = arith.constant 0 : index
    %3 = vector.load %arg19[%c0, %c0_1] : memref<8x32xf32, #tpu.memory_space<vmem>>, vector<8x32xf32>
    %c0_2 = arith.constant 0 : index
    %c0_3 = arith.constant 0 : index
    %c0_4 = arith.constant 0 : index
    %4 = vector.load %arg3[%c0_2, %c0_3, %c0_4] : memref<1x1x32xf32, #tpu.memory_space<vmem>>, vector<1x1x32xf32>
    %5 = vector.shape_cast %4 : vector<1x1x32xf32> to vector<1x32xf32>
    %c0_5 = arith.constant 0 : index
    %c0_6 = arith.constant 0 : index
    %c0_7 = arith.constant 0 : index
    %6 = vector.load %arg4[%c0_5, %c0_6, %c0_7] : memref<1x1x32xf32, #tpu.memory_space<vmem>>, vector<1x1x32xf32>
    %7 = vector.shape_cast %6 : vector<1x1x32xf32> to vector<1x32xf32>
    %cst = arith.constant dense<0.000000e+00> : vector<8xf32>
    %8 = vector.multi_reduction <add>, %3, %cst [1] : vector<8x32xf32> to vector<8xf32>
    %9 = vector.shape_cast %8 : vector<8xf32> to vector<8x1xf32>
    %cst_8 = arith.constant 3.200000e+01 : f32
    %10 = vector.broadcast %cst_8 : f32 to vector<8x1xf32>
    %11 = arith.divf %9, %10 : vector<8x1xf32>
    %12 = vector.broadcast %11 : vector<8x1xf32> to vector<8x32xf32>
    %13 = arith.subf %3, %12 : vector<8x32xf32>
    %14 = arith.mulf %13, %13 : vector<8x32xf32>
    %cst_9 = arith.constant dense<0.000000e+00> : vector<8xf32>
    %15 = vector.multi_reduction <add>, %14, %cst_9 [1] : vector<8x32xf32> to vector<8xf32>
    %16 = vector.shape_cast %15 : vector<8xf32> to vector<8x1xf32>
    %cst_10 = arith.constant 3.200000e+01 : f32
    %17 = vector.broadcast %cst_10 : f32 to vector<8x1xf32>
    %18 = arith.divf %16, %17 : vector<8x1xf32>
    %19 = vector.broadcast %11 : vector<8x1xf32> to vector<8x32xf32>
    %20 = arith.subf %3, %19 : vector<8x32xf32>
    %cst_11 = arith.constant 9.99999997E-7 : f32
    %21 = vector.broadcast %cst_11 : f32 to vector<8x1xf32>
    %22 = arith.addf %18, %21 : vector<8x1xf32>
    %23 = math.rsqrt %22 : vector<8x1xf32>
    %24 = vector.broadcast %23 : vector<8x1xf32> to vector<8x32xf32>
    %25 = arith.mulf %20, %24 : vector<8x32xf32>
    %26 = vector.broadcast %5 : vector<1x32xf32> to vector<8x32xf32>
    %27 = arith.mulf %25, %26 : vector<8x32xf32>
    %28 = vector.broadcast %7 : vector<1x32xf32> to vector<8x32xf32>
    %29 = arith.addf %27, %28 : vector<8x32xf32>
    %c0_12 = arith.constant 0 : index
    %c0_13 = arith.constant 0 : index
    %c0_14 = arith.constant 0 : index
    %30 = vector.load %arg5[%c0_12, %c0_13, %c0_14] : memref<1x32x96xf32, #tpu.memory_space<vmem>>, vector<1x32x96xf32>
    %31 = vector.shape_cast %30 : vector<1x32x96xf32> to vector<32x96xf32>
    %cst_15 = arith.constant dense<0.000000e+00> : vector<8x96xf32>
    %32 = tpu.matmul %29, %31, %cst_15 {dimension_numbers = #tpu.dot_dimension_numbers<[1], [0], [0], [1], [0, 0, 1, 1], [], []>} : vector<8x32xf32>, vector<32x96xf32>, vector<8x96xf32> -> vector<8x96xf32>
    %c0_16 = arith.constant 0 : index
    %c0_17 = arith.constant 0 : index
    %c0_18 = arith.constant 0 : index
    %33 = vector.load %arg6[%c0_16, %c0_17, %c0_18] : memref<1x1x96xf32, #tpu.memory_space<vmem>>, vector<1x1x96xf32>
    %34 = vector.shape_cast %33 : vector<1x1x96xf32> to vector<1x96xf32>
    %35 = vector.broadcast %34 : vector<1x96xf32> to vector<8x96xf32>
    %36 = arith.addf %32, %35 : vector<8x96xf32>
    %37 = vector.extract_strided_slice %36 {offsets = [0, 0], sizes = [8, 8], strides = [1, 1]} : vector<8x96xf32> to vector<8x8xf32>
    %38 = vector.extract_strided_slice %36 {offsets = [0, 8], sizes = [8, 8], strides = [1, 1]} : vector<8x96xf32> to vector<8x8xf32>
    %39 = vector.extract_strided_slice %36 {offsets = [0, 16], sizes = [8, 8], strides = [1, 1]} : vector<8x96xf32> to vector<8x8xf32>
    %40 = vector.extract_strided_slice %36 {offsets = [0, 24], sizes = [8, 8], strides = [1, 1]} : vector<8x96xf32> to vector<8x8xf32>
    %41 = vector.shape_cast %37 : vector<8x8xf32> to vector<1x8x8xf32>
    %42 = vector.shape_cast %38 : vector<8x8xf32> to vector<1x8x8xf32>
    %43 = vector.shape_cast %39 : vector<8x8xf32> to vector<1x8x8xf32>
    %44 = vector.shape_cast %40 : vector<8x8xf32> to vector<1x8x8xf32>
    %45 = tpu.concatenate %41, %42, %43, %44 in 0 : vector<1x8x8xf32>, vector<1x8x8xf32>, vector<1x8x8xf32>, vector<1x8x8xf32> -> vector<4x8x8xf32>
    %cst_19 = arith.constant 0.353553385 : f32
    %46 = vector.broadcast %cst_19 : f32 to vector<4x8x8xf32>
    %47 = arith.mulf %45, %46 : vector<4x8x8xf32>
    %48 = vector.extract_strided_slice %36 {offsets = [0, 32], sizes = [8, 8], strides = [1, 1]} : vector<8x96xf32> to vector<8x8xf32>
    %49 = vector.extract_strided_slice %36 {offsets = [0, 40], sizes = [8, 8], strides = [1, 1]} : vector<8x96xf32> to vector<8x8xf32>
    %50 = vector.extract_strided_slice %36 {offsets = [0, 48], sizes = [8, 8], strides = [1, 1]} : vector<8x96xf32> to vector<8x8xf32>
    %51 = vector.extract_strided_slice %36 {offsets = [0, 56], sizes = [8, 8], strides = [1, 1]} : vector<8x96xf32> to vector<8x8xf32>
    %52 = vector.shape_cast %48 : vector<8x8xf32> to vector<1x8x8xf32>
    %53 = vector.shape_cast %49 : vector<8x8xf32> to vector<1x8x8xf32>
    %54 = vector.shape_cast %50 : vector<8x8xf32> to vector<1x8x8xf32>
    %55 = vector.shape_cast %51 : vector<8x8xf32> to vector<1x8x8xf32>
    %56 = tpu.concatenate %52, %53, %54, %55 in 0 : vector<1x8x8xf32>, vector<1x8x8xf32>, vector<1x8x8xf32>, vector<1x8x8xf32> -> vector<4x8x8xf32>
    %57 = vector.extract_strided_slice %36 {offsets = [0, 64], sizes = [8, 8], strides = [1, 1]} : vector<8x96xf32> to vector<8x8xf32>
    %58 = vector.extract_strided_slice %36 {offsets = [0, 72], sizes = [8, 8], strides = [1, 1]} : vector<8x96xf32> to vector<8x8xf32>
    %59 = vector.extract_strided_slice %36 {offsets = [0, 80], sizes = [8, 8], strides = [1, 1]} : vector<8x96xf32> to vector<8x8xf32>
    %60 = vector.extract_strided_slice %36 {offsets = [0, 88], sizes = [8, 8], strides = [1, 1]} : vector<8x96xf32> to vector<8x8xf32>
    %61 = vector.shape_cast %57 : vector<8x8xf32> to vector<1x8x8xf32>
    %62 = vector.shape_cast %58 : vector<8x8xf32> to vector<1x8x8xf32>
    %63 = vector.shape_cast %59 : vector<8x8xf32> to vector<1x8x8xf32>
    %64 = vector.shape_cast %60 : vector<8x8xf32> to vector<1x8x8xf32>
    %65 = tpu.concatenate %61, %62, %63, %64 in 0 : vector<1x8x8xf32>, vector<1x8x8xf32>, vector<1x8x8xf32>, vector<1x8x8xf32> -> vector<4x8x8xf32>
    "tpu.trace_start"() <{level = 10 : i32, message = "gid,gjd->gij"}> : () -> ()
    %cst_20 = arith.constant dense<0.000000e+00> : vector<4x8x8xf32>
    %66 = tpu.matmul %47, %56, %cst_20 {dimension_numbers = #tpu.dot_dimension_numbers<[2], [2], [1], [1], [0, 0, 0, 1, 1, 1], [0], [0]>} : vector<4x8x8xf32>, vector<4x8x8xf32>, vector<4x8x8xf32> -> vector<4x8x8xf32>
    "tpu.trace_stop"() : () -> ()
    %cst_21 = arith.constant dense<0xFF800000> : vector<4x8xf32>
    %67 = vector.multi_reduction <maximumf>, %66, %cst_21 [2] : vector<4x8x8xf32> to vector<4x8xf32>
    %68 = vector.shape_cast %67 : vector<4x8xf32> to vector<4x8x1xf32>
    %69 = vector.broadcast %68 : vector<4x8x1xf32> to vector<4x8x8xf32>
    %70 = arith.subf %66, %69 : vector<4x8x8xf32>
    %71 = math.exp %70 : vector<4x8x8xf32>
    %cst_22 = arith.constant dense<0.000000e+00> : vector<4x8xf32>
    %72 = vector.multi_reduction <add>, %71, %cst_22 [2] : vector<4x8x8xf32> to vector<4x8xf32>
    %73 = vector.shape_cast %72 : vector<4x8xf32> to vector<4x8x1xf32>
    %74 = tpu.reciprocal %73 : vector<4x8x1xf32> -> vector<4x8x1xf32>
    %75 = vector.broadcast %74 : vector<4x8x1xf32> to vector<4x8x8xf32>
    %76 = arith.mulf %71, %75 : vector<4x8x8xf32>
    %77 = vector.shape_cast %76 : vector<4x8x8xf32> to vector<4x1x8x8xf32>
    %c0_23 = arith.constant 0 : index
    %c0_24 = arith.constant 0 : index
    %c0_25 = arith.constant 0 : index
    %c0_26 = arith.constant 0 : index
    %78 = vector.load %arg18[%c0_23, %c0_24, %c0_25, %c0_26] : memref<4x1x8x8xf32, #tpu.memory_space<vmem>>, vector<4x1x8x8xf32>
    tpu.vector_store %arg18[%c0_23, %c0_24, %c0_25, %c0_26], %77 {strides = array<i32>} : memref<4x1x8x8xf32, #tpu.memory_space<vmem>>, vector<4x1x8x8xf32>,
    "tpu.trace_start"() <{level = 10 : i32, message = "gij,gjd->gid"}> : () -> ()
    %cst_27 = arith.constant dense<0.000000e+00> : vector<4x8x8xf32>
    %79 = tpu.matmul %76, %65, %cst_27 {dimension_numbers = #tpu.dot_dimension_numbers<[2], [1], [1], [2], [0, 0, 0, 1, 1, 2], [0], [0]>} : vector<4x8x8xf32>, vector<4x8x8xf32>, vector<4x8x8xf32> -> vector<4x8x8xf32>
    "tpu.trace_stop"() : () -> ()
    %80 = vector.extract_strided_slice %79 {offsets = [0, 0, 0], sizes = [1, 8, 8], strides = [1, 1, 1]} : vector<4x8x8xf32> to vector<1x8x8xf32>
    %81 = vector.shape_cast %80 : vector<1x8x8xf32> to vector<8x8xf32>
    %82 = vector.extract_strided_slice %79 {offsets = [1, 0, 0], sizes = [1, 8, 8], strides = [1, 1, 1]} : vector<4x8x8xf32> to vector<1x8x8xf32>
    %83 = vector.shape_cast %82 : vector<1x8x8xf32> to vector<8x8xf32>
    %84 = vector.extract_strided_slice %79 {offsets = [2, 0, 0], sizes = [1, 8, 8], strides = [1, 1, 1]} : vector<4x8x8xf32> to vector<1x8x8xf32>
    %85 = vector.shape_cast %84 : vector<1x8x8xf32> to vector<8x8xf32>
    %86 = vector.extract_strided_slice %79 {offsets = [3, 0, 0], sizes = [1, 8, 8], strides = [1, 1, 1]} : vector<4x8x8xf32> to vector<1x8x8xf32>
    %87 = vector.shape_cast %86 : vector<1x8x8xf32> to vector<8x8xf32>
    %88 = tpu.concatenate %81, %83, %85, %87 in 1 : vector<8x8xf32>, vector<8x8xf32>, vector<8x8xf32>, vector<8x8xf32> -> vector<8x32xf32>
    %c0_28 = arith.constant 0 : index
    %c0_29 = arith.constant 0 : index
    %c0_30 = arith.constant 0 : index
    %89 = vector.load %arg7[%c0_28, %c0_29, %c0_30] : memref<1x32x32xf32, #tpu.memory_space<vmem>>, vector<1x32x32xf32>
    %90 = vector.shape_cast %89 : vector<1x32x32xf32> to vector<32x32xf32>
    %cst_31 = arith.constant dense<0.000000e+00> : vector<8x32xf32>
    %91 = tpu.matmul %88, %90, %cst_31 {dimension_numbers = #tpu.dot_dimension_numbers<[1], [0], [0], [1], [0, 0, 1, 1], [], []>} : vector<8x32xf32>, vector<32x32xf32>, vector<8x32xf32> -> vector<8x32xf32>
    %c0_32 = arith.constant 0 : index
    %c0_33 = arith.constant 0 : index
    %c0_34 = arith.constant 0 : index
    %92 = vector.load %arg8[%c0_32, %c0_33, %c0_34] : memref<1x1x32xf32, #tpu.memory_space<vmem>>, vector<1x1x32xf32>
    %93 = vector.shape_cast %92 : vector<1x1x32xf32> to vector<1x32xf32>
    %94 = vector.broadcast %93 : vector<1x32xf32> to vector<8x32xf32>
    %95 = arith.addf %91, %94 : vector<8x32xf32>
    %96 = arith.addf %3, %95 : vector<8x32xf32>
    %c0_35 = arith.constant 0 : index
    %c0_36 = arith.constant 0 : index
    %c0_37 = arith.constant 0 : index
    %97 = vector.load %arg9[%c0_35, %c0_36, %c0_37] : memref<1x1x32xf32, #tpu.memory_space<vmem>>, vector<1x1x32xf32>
    %98 = vector.shape_cast %97 : vector<1x1x32xf32> to vector<1x32xf32>
    %c0_38 = arith.constant 0 : index
    %c0_39 = arith.constant 0 : index
    %c0_40 = arith.constant 0 : index
    %99 = vector.load %arg10[%c0_38, %c0_39, %c0_40] : memref<1x1x32xf32, #tpu.memory_space<vmem>>, vector<1x1x32xf32>
    %100 = vector.shape_cast %99 : vector<1x1x32xf32> to vector<1x32xf32>
    %cst_41 = arith.constant dense<0.000000e+00> : vector<8xf32>
    %101 = vector.multi_reduction <add>, %96, %cst_41 [1] : vector<8x32xf32> to vector<8xf32>
    %102 = vector.shape_cast %101 : vector<8xf32> to vector<8x1xf32>
    %cst_42 = arith.constant 3.200000e+01 : f32
    %103 = vector.broadcast %cst_42 : f32 to vector<8x1xf32>
    %104 = arith.divf %102, %103 : vector<8x1xf32>
    %105 = vector.broadcast %104 : vector<8x1xf32> to vector<8x32xf32>
    %106 = arith.subf %96, %105 : vector<8x32xf32>
    %107 = arith.mulf %106, %106 : vector<8x32xf32>
    %cst_43 = arith.constant dense<0.000000e+00> : vector<8xf32>
    %108 = vector.multi_reduction <add>, %107, %cst_43 [1] : vector<8x32xf32> to vector<8xf32>
    %109 = vector.shape_cast %108 : vector<8xf32> to vector<8x1xf32>
    %cst_44 = arith.constant 3.200000e+01 : f32
    %110 = vector.broadcast %cst_44 : f32 to vector<8x1xf32>
    %111 = arith.divf %109, %110 : vector<8x1xf32>
    %112 = vector.broadcast %104 : vector<8x1xf32> to vector<8x32xf32>
    %113 = arith.subf %96, %112 : vector<8x32xf32>
    %cst_45 = arith.constant 9.99999997E-7 : f32
    %114 = vector.broadcast %cst_45 : f32 to vector<8x1xf32>
    %115 = arith.addf %111, %114 : vector<8x1xf32>
    %116 = math.rsqrt %115 : vector<8x1xf32>
    %117 = vector.broadcast %116 : vector<8x1xf32> to vector<8x32xf32>
    %118 = arith.mulf %113, %117 : vector<8x32xf32>
    %119 = vector.broadcast %98 : vector<1x32xf32> to vector<8x32xf32>
    %120 = arith.mulf %118, %119 : vector<8x32xf32>
    %121 = vector.broadcast %100 : vector<1x32xf32> to vector<8x32xf32>
    %122 = arith.addf %120, %121 : vector<8x32xf32>
    %c0_46 = arith.constant 0 : index
    %c0_47 = arith.constant 0 : index
    %c0_48 = arith.constant 0 : index
    %123 = vector.load %arg11[%c0_46, %c0_47, %c0_48] : memref<1x32x64xf32, #tpu.memory_space<vmem>>, vector<1x32x64xf32>
    %124 = vector.shape_cast %123 : vector<1x32x64xf32> to vector<32x64xf32>
    %c0_49 = arith.constant 0 : index
    %c0_50 = arith.constant 0 : index
    %c0_51 = arith.constant 0 : index
    %125 = vector.load %arg13[%c0_49, %c0_50, %c0_51] : memref<1x64x32xf32, #tpu.memory_space<vmem>>, vector<1x64x32xf32>
    %126 = vector.shape_cast %125 : vector<1x64x32xf32> to vector<64x32xf32>
    %cst_52 = arith.constant dense<0.000000e+00> : vector<8x64xf32>
    %127 = tpu.matmul %122, %124, %cst_52 {dimension_numbers = #tpu.dot_dimension_numbers<[1], [0], [0], [1], [0, 0, 1, 1], [], []>} : vector<8x32xf32>, vector<32x64xf32>, vector<8x64xf32> -> vector<8x64xf32>
    %c0_53 = arith.constant 0 : index
    %c0_54 = arith.constant 0 : index
    %c0_55 = arith.constant 0 : index
    %128 = vector.load %arg12[%c0_53, %c0_54, %c0_55] : memref<1x1x64xf32, #tpu.memory_space<vmem>>, vector<1x1x64xf32>
    %129 = vector.shape_cast %128 : vector<1x1x64xf32> to vector<1x64xf32>
    %130 = vector.broadcast %129 : vector<1x64xf32> to vector<8x64xf32>
    %131 = arith.addf %127, %130 : vector<8x64xf32>
    %cst_56 = arith.constant 5.000000e-01 : f32
    %132 = vector.broadcast %cst_56 : f32 to vector<8x64xf32>
    %133 = arith.mulf %132, %131 : vector<8x64xf32>
    %cst_57 = arith.constant 0.707106769 : f32
    %134 = vector.broadcast %cst_57 : f32 to vector<8x64xf32>
    %135 = arith.mulf %131, %134 : vector<8x64xf32>
    %cst_58 = arith.constant 0.000000e+00 : f32
    %136 = vector.broadcast %cst_58 : f32 to vector<8x64xf32>
    %137 = arith.cmpf oge, %135, %136 : vector<8x64xf32>
    %cst_59 = arith.constant 1.000000e+00 : f32
    %cst_60 = arith.constant -1.000000e+00 : f32
    %138 = vector.broadcast %cst_59 : f32 to vector<8x64xf32>
    %139 = vector.broadcast %cst_60 : f32 to vector<8x64xf32>
    %140 = arith.select %137, %138, %139 : vector<8x64xi1>, vector<8x64xf32>
    %141 = math.absf %135 : vector<8x64xf32>
    %cst_61 = arith.constant 0.327591091 : f32
    %142 = vector.broadcast %cst_61 : f32 to vector<8x64xf32>
    %143 = arith.mulf %142, %141 : vector<8x64xf32>
    %cst_62 = arith.constant 1.000000e+00 : f32
    %144 = vector.broadcast %cst_62 : f32 to vector<8x64xf32>
    %145 = arith.addf %144, %143 : vector<8x64xf32>
    %cst_63 = arith.constant 1.000000e+00 : f32
    %146 = vector.broadcast %cst_63 : f32 to vector<8x64xf32>
    %147 = arith.divf %146, %145 : vector<8x64xf32>
    %cst_64 = arith.constant 1.06140542 : f32
    %148 = vector.broadcast %cst_64 : f32 to vector<8x64xf32>
    %149 = arith.mulf %148, %147 : vector<8x64xf32>
    %cst_65 = arith.constant -1.45315206 : f32
    %150 = vector.broadcast %cst_65 : f32 to vector<8x64xf32>
    %151 = arith.addf %149, %150 : vector<8x64xf32>
    %152 = arith.mulf %151, %147 : vector<8x64xf32>
    %cst_66 = arith.constant 1.42141378 : f32
    %153 = vector.broadcast %cst_66 : f32 to vector<8x64xf32>
    %154 = arith.addf %152, %153 : vector<8x64xf32>
    %155 = arith.mulf %154, %147 : vector<8x64xf32>
    %cst_67 = arith.constant -0.284496725 : f32
    %156 = vector.broadcast %cst_67 : f32 to vector<8x64xf32>
    %157 = arith.addf %155, %156 : vector<8x64xf32>
    %158 = arith.mulf %157, %147 : vector<8x64xf32>
    %cst_68 = arith.constant 0.254829586 : f32
    %159 = vector.broadcast %cst_68 : f32 to vector<8x64xf32>
    %160 = arith.addf %158, %159 : vector<8x64xf32>
    %161 = arith.mulf %160, %147 : vector<8x64xf32>
    %cst_69 = arith.constant 0.000000e+00 : f32
    %162 = vector.broadcast %cst_69 : f32 to vector<8x64xf32>
    %163 = arith.subf %162, %141 : vector<8x64xf32>
    %164 = arith.mulf %163, %141 : vector<8x64xf32>
    %165 = math.exp %164 : vector<8x64xf32>
    %166 = arith.mulf %161, %165 : vector<8x64xf32>
    %cst_70 = arith.constant 1.000000e+00 : f32
    %167 = vector.broadcast %cst_70 : f32 to vector<8x64xf32>
    %168 = arith.subf %167, %166 : vector<8x64xf32>
    %169 = arith.mulf %140, %168 : vector<8x64xf32>
    %cst_71 = arith.constant 1.000000e+00 : f32
    %170 = vector.broadcast %cst_71 : f32 to vector<8x64xf32>
    %171 = arith.addf %170, %169 : vector<8x64xf32>
    %172 = arith.mulf %133, %171 : vector<8x64xf32>
    %cst_72 = arith.constant dense<0.000000e+00> : vector<8x32xf32>
    %173 = tpu.matmul %172, %126, %cst_72 {dimension_numbers = #tpu.dot_dimension_numbers<[1], [0], [0], [1], [0, 0, 1, 1], [], []>} : vector<8x64xf32>, vector<64x32xf32>, vector<8x32xf32> -> vector<8x32xf32>
    %c0_73 = arith.constant 0 : index
    %c0_74 = arith.constant 0 : index
    %c0_75 = arith.constant 0 : index
    %174 = vector.load %arg14[%c0_73, %c0_74, %c0_75] : memref<1x1x32xf32, #tpu.memory_space<vmem>>, vector<1x1x32xf32>
    %175 = vector.shape_cast %174 : vector<1x1x32xf32> to vector<1x32xf32>
    %176 = vector.broadcast %175 : vector<1x32xf32> to vector<8x32xf32>
    %177 = arith.addf %173, %176 : vector<8x32xf32>
    %178 = arith.addf %96, %177 : vector<8x32xf32>
    %c0_76 = arith.constant 0 : index
    %c0_77 = arith.constant 0 : index
    %179 = vector.load %arg19[%c0_76, %c0_77] : memref<8x32xf32, #tpu.memory_space<vmem>>, vector<8x32xf32>
    tpu.vector_store %arg19[%c0_76, %c0_77], %178 {strides = array<i32>} : memref<8x32xf32, #tpu.memory_space<vmem>>, vector<8x32xf32>,
    %c1_i32 = arith.constant 1 : i32
    %180 = arith.cmpi eq, %arg1, %c1_i32 : i32
    %181 = arith.extui %180 : i1 to i32
    %c0_i32_78 = arith.constant 0 : i32
    %182 = arith.cmpi ne, %181, %c0_i32_78 : i32
    scf.if %182 {
      %c0_79 = arith.constant 0 : index
      %c0_80 = arith.constant 0 : index
      %183 = vector.load %arg15[%c0_79, %c0_80] : memref<1x32xf32, #tpu.memory_space<vmem>>, vector<1x32xf32>
      %c0_81 = arith.constant 0 : index
      %c0_82 = arith.constant 0 : index
      %184 = vector.load %arg16[%c0_81, %c0_82] : memref<1x32xf32, #tpu.memory_space<vmem>>, vector<1x32xf32>
      %cst_83 = arith.constant dense<0.000000e+00> : vector<8xf32>
      %185 = vector.multi_reduction <add>, %178, %cst_83 [1] : vector<8x32xf32> to vector<8xf32>
      %186 = vector.shape_cast %185 : vector<8xf32> to vector<8x1xf32>
      %cst_84 = arith.constant 3.200000e+01 : f32
      %187 = vector.broadcast %cst_84 : f32 to vector<8x1xf32>
      %188 = arith.divf %186, %187 : vector<8x1xf32>
      %189 = vector.broadcast %188 : vector<8x1xf32> to vector<8x32xf32>
      %190 = arith.subf %178, %189 : vector<8x32xf32>
      %191 = arith.mulf %190, %190 : vector<8x32xf32>
      %cst_85 = arith.constant dense<0.000000e+00> : vector<8xf32>
      %192 = vector.multi_reduction <add>, %191, %cst_85 [1] : vector<8x32xf32> to vector<8xf32>
      %193 = vector.shape_cast %192 : vector<8xf32> to vector<8x1xf32>
      %cst_86 = arith.constant 3.200000e+01 : f32
      %194 = vector.broadcast %cst_86 : f32 to vector<8x1xf32>
      %195 = arith.divf %193, %194 : vector<8x1xf32>
      %196 = vector.broadcast %188 : vector<8x1xf32> to vector<8x32xf32>
      %197 = arith.subf %178, %196 : vector<8x32xf32>
      %cst_87 = arith.constant 9.99999997E-7 : f32
      %198 = vector.broadcast %cst_87 : f32 to vector<8x1xf32>
      %199 = arith.addf %195, %198 : vector<8x1xf32>
      %200 = math.rsqrt %199 : vector<8x1xf32>
      %201 = vector.broadcast %200 : vector<8x1xf32> to vector<8x32xf32>
      %202 = arith.mulf %197, %201 : vector<8x32xf32>
      %203 = vector.broadcast %183 : vector<1x32xf32> to vector<8x32xf32>
      %204 = arith.mulf %202, %203 : vector<8x32xf32>
      %205 = vector.broadcast %184 : vector<1x32xf32> to vector<8x32xf32>
      %206 = arith.addf %204, %205 : vector<8x32xf32>
      %207 = vector.shape_cast %206 : vector<8x32xf32> to vector<1x8x32xf32>
      %c0_88 = arith.constant 0 : index
      %c0_89 = arith.constant 0 : index
      %c0_90 = arith.constant 0 : index
      %208 = vector.load %arg17[%c0_88, %c0_89, %c0_90] : memref<1x8x32xf32, #tpu.memory_space<vmem>>, vector<1x8x32xf32>
      tpu.vector_store %arg17[%c0_88, %c0_89, %c0_90], %207 {strides = array<i32>} : memref<1x8x32xf32, #tpu.memory_space<vmem>>, vector<1x8x32xf32>,
    } else {
    }
    return
  }
  func.func @transform_0(%arg0: i32, %arg1: i32) -> (i32, i32, i32) {
    %c0_i32 = arith.constant 0 : i32
    %c0_i32_0 = arith.constant 0 : i32
    %c0_i32_1 = arith.constant 0 : i32
    return %arg0, %c0_i32, %c0_i32_0 : i32, i32, i32
  }
  func.func @transform_1(%arg0: i32, %arg1: i32) -> (i32, i32, i32) {
    %c0_i32 = arith.constant 0 : i32
    %c0_i32_0 = arith.constant 0 : i32
    %c0_i32_1 = arith.constant 0 : i32
    return %arg1, %c0_i32, %c0_i32_0 : i32, i32, i32
  }
  func.func @transform_2(%arg0: i32, %arg1: i32) -> (i32, i32, i32) {
    %c0_i32 = arith.constant 0 : i32
    %c0_i32_0 = arith.constant 0 : i32
    %c0_i32_1 = arith.constant 0 : i32
    return %arg1, %c0_i32, %c0_i32_0 : i32, i32, i32
  }
  func.func @transform_3(%arg0: i32, %arg1: i32) -> (i32, i32, i32) {
    %c0_i32 = arith.constant 0 : i32
    %c0_i32_0 = arith.constant 0 : i32
    %c0_i32_1 = arith.constant 0 : i32
    return %arg1, %c0_i32, %c0_i32_0 : i32, i32, i32
  }
  func.func @transform_4(%arg0: i32, %arg1: i32) -> (i32, i32, i32) {
    %c0_i32 = arith.constant 0 : i32
    %c0_i32_0 = arith.constant 0 : i32
    %c0_i32_1 = arith.constant 0 : i32
    return %arg1, %c0_i32, %c0_i32_0 : i32, i32, i32
  }
  func.func @transform_5(%arg0: i32, %arg1: i32) -> (i32, i32, i32) {
    %c0_i32 = arith.constant 0 : i32
    %c0_i32_0 = arith.constant 0 : i32
    %c0_i32_1 = arith.constant 0 : i32
    return %arg1, %c0_i32, %c0_i32_0 : i32, i32, i32
  }
  func.func @transform_6(%arg0: i32, %arg1: i32) -> (i32, i32, i32) {
    %c0_i32 = arith.constant 0 : i32
    %c0_i32_0 = arith.constant 0 : i32
    %c0_i32_1 = arith.constant 0 : i32
    return %arg1, %c0_i32, %c0_i32_0 : i32, i32, i32
  }
  func.func @transform_7(%arg0: i32, %arg1: i32) -> (i32, i32, i32) {
    %c0_i32 = arith.constant 0 : i32
    %c0_i32_0 = arith.constant 0 : i32
    %c0_i32_1 = arith.constant 0 : i32
    return %arg1, %c0_i32, %c0_i32_0 : i32, i32, i32
  }
  func.func @transform_8(%arg0: i32, %arg1: i32) -> (i32, i32, i32) {
    %c0_i32 = arith.constant 0 : i32
    %c0_i32_0 = arith.constant 0 : i32
    %c0_i32_1 = arith.constant 0 : i32
    return %arg1, %c0_i32, %c0_i32_0 : i32, i32, i32
  }
  func.func @transform_9(%arg0: i32, %arg1: i32) -> (i32, i32, i32) {
    %c0_i32 = arith.constant 0 : i32
    %c0_i32_0 = arith.constant 0 : i32
    %c0_i32_1 = arith.constant 0 : i32
    return %arg1, %c0_i32, %c0_i32_0 : i32, i32, i32
  }
  func.func @transform_10(%arg0: i32, %arg1: i32) -> (i32, i32, i32) {
    %c0_i32 = arith.constant 0 : i32
    %c0_i32_0 = arith.constant 0 : i32
    %c0_i32_1 = arith.constant 0 : i32
    return %arg1, %c0_i32, %c0_i32_0 : i32, i32, i32
  }
  func.func @transform_11(%arg0: i32, %arg1: i32) -> (i32, i32, i32) {
    %c0_i32 = arith.constant 0 : i32
    %c0_i32_0 = arith.constant 0 : i32
    %c0_i32_1 = arith.constant 0 : i32
    return %arg1, %c0_i32, %c0_i32_0 : i32, i32, i32
  }
  func.func @transform_12(%arg0: i32, %arg1: i32) -> (i32, i32, i32) {
    %c0_i32 = arith.constant 0 : i32
    %c0_i32_0 = arith.constant 0 : i32
    %c0_i32_1 = arith.constant 0 : i32
    return %arg1, %c0_i32, %c0_i32_0 : i32, i32, i32
  }
  func.func @transform_13(%arg0: i32, %arg1: i32) -> (i32, i32) {
    %c0_i32 = arith.constant 0 : i32
    %c0_i32_0 = arith.constant 0 : i32
    %c0_i32_1 = arith.constant 0 : i32
    return %c0_i32, %c0_i32_0 : i32, i32
  }
  func.func @transform_14(%arg0: i32, %arg1: i32) -> (i32, i32) {
    %c0_i32 = arith.constant 0 : i32
    %c0_i32_0 = arith.constant 0 : i32
    %c0_i32_1 = arith.constant 0 : i32
    return %c0_i32, %c0_i32_0 : i32, i32
  }
  func.func @transform_15(%arg0: i32, %arg1: i32) -> (i32, i32, i32) {
    %c0_i32 = arith.constant 0 : i32
    %c0_i32_0 = arith.constant 0 : i32
    %c0_i32_1 = arith.constant 0 : i32
    return %arg0, %c0_i32, %c0_i32_0 : i32, i32, i32
  }
  func.func @transform_16(%arg0: i32, %arg1: i32) -> (i32, i32, i32, i32) {
    %c0_i32 = arith.constant 0 : i32
    %c0_i32_0 = arith.constant 0 : i32
    %c0_i32_1 = arith.constant 0 : i32
    return %arg1, %arg0, %c0_i32, %c0_i32_0 : i32, i32, i32, i32
  }
}

</mosaic_0001>

<bundles_post_ra>
// kernel: tpu_custom_call.1
= control target key start
LH: loop header
LB: loop body
LE: loop exit
PB: predicated region body
PF: predicated region fallthrough
CT: control target
= control target key end

     0   :  { %s3377_s0 = inlined_call_operand.hbm [shape: f32[2,8,32], index: 0, kind: input, shape index: {}]   ;;  %s3378_s1 = inlined_call_operand.vmem [shape: f32[2,1,32], index: 1, kind: input, shape index: {}]   ;;  %s3379_s2 = inlined_call_operand.vmem [shape: f32[2,1,32], index: 2, kind: input, shape index: {}]   ;;  %s3380_s3 = inlined_call_operand.vmem [shape: f32[2,32,96], index: 3, kind: input, shape index: {}]   ;;  %s3381_s4 = inlined_call_operand.vmem [shape: f32[2,1,96], index: 4, kind: input, shape index: {}]   ;;  %s3382_s5 = inlined_call_operand.vmem [shape: f32[2,32,32], index: 5, kind: input, shape index: {}]   ;;  %s3383_s6 = inlined_call_operand.vmem [shape: f32[2,1,32], index: 6, kind: input, shape index: {}]   ;;  %s3384_s7 = inlined_call_operand.vmem [shape: f32[2,1,32], index: 7, kind: input, shape index: {}]   ;;  %s3385_s8 = inlined_call_operand.vmem [shape: f32[2,1,32], index: 8, kind: input, shape index: {}]   ;;  %s3386_s9 = inlined_call_operand.vmem [shape: f32[2,32,64], index: 9, kind: input, shape index: {}]   ;;  %s3387_s10 = inlined_call_operand.vmem [shape: f32[2,1,64], index: 10, kind: input, shape index: {}]   ;;  %s3388_s11 = inlined_call_operand.vmem [shape: f32[2,64,32], index: 11, kind: input, shape index: {}]   ;;  %s3389_s12 = inlined_call_operand.vmem [shape: f32[2,1,32], index: 12, kind: input, shape index: {}]   ;;  %s3390_s13 = inlined_call_operand.vmem [shape: f32[1,32], index: 13, kind: input, shape index: {}]   ;;  %s3391_s14 = inlined_call_operand.vmem [shape: f32[1,32], index: 14, kind: input, shape index: {}]   ;;  %s3392_s15 = inlined_call_operand.hbm [shape: f32[2,8,32], index: 15, kind: output, shape index: {0}]   ;;  %s3393_s16 = inlined_call_operand.hbm [shape: f32[8,2,8,8], index: 16, kind: output, shape index: {1}]  }
   0x1   :  { %3422 = sst [smem:[#allocation32_spill]] %s3377_s0 }
   0x2   :  { %3423 = sst [smem:[#allocation33_spill]] %s3380_s3 }
   0x3   :  { %3424 = sst [smem:[#allocation34_spill]] %s3382_s5 }
   0x4   :  { %3425 = sst [smem:[#allocation35_spill]] %s3383_s6 }
   0x5   :  { %3426 = sst [smem:[#allocation36_spill]] %s3386_s9 }
   0x6   :  { %3427 = sst [smem:[#allocation37_spill]] %s3387_s10 }
   0x7   :  { %3428 = sst [smem:[#allocation38_spill]] %s3388_s11 }
   0x8   :  { %3429 = sst [smem:[#allocation39_spill]] %s3389_s12 }
   0x9   :  { %3430 = sst [smem:[#allocation40_spill]] %s3390_s13 }
   0xa   :  { %3431 = sst [smem:[#allocation41_spill]] %s3391_s14 }
   0xb   :  { %3432 = sst [smem:[#allocation42_spill]] %s3392_s15 }
   0xc   :  { %3433 = sst [smem:[#allocation43_spill]] %s3393_s16 }
   0xd   :  { %22 = vsyncpa [#allocation4], 0 }
   0xe   :  { %24 = vsyncpa [#allocation4 + $0x1], 0 }
   0xf   :  { %25 = vsyncpa [#allocation5], 0 }
  0x10   :  { %27 = vsyncpa [#allocation5 + $0x1], 0 }
  0x11   :  { %28 = vsyncpa [#allocation8], 0 }
  0x12   :  { %30 = vsyncpa [#allocation8 + $0x1], 0  ;;  %s2848_s21 = smov 0   ;;  %s2850_s22 = smov 0  }
  0x13   :  { %s2852_s23 = smov 0   ;;  %s2854_s24 = smov 0  }
  0x14   :  { %s2856_s25 = smov 0   ;;  %s2858_s26 = smov 0  }
  0x15   :  { %s2860_s27 = smov 0   ;;  %s2862_s28 = smov 0  }
  0x16   :  { %s2864_s29 = smov 0   ;;  %s2866_s30 = smov 0  }
  0x17   :  { %s2868_s0 = smov 0  }
  0x18 LB: > { %3434 = sst [smem:[#allocation12_spill]] %s2704_s21  ;;  %s2192_s17 = sadd.s32 4294967295, %s2744_s0   ;;  %s2744_s0 = sphi %s2868_s0, %s36_s0   ;;  %s2740_s30 = sphi %s2866_s30, %s3512_s30   ;;  %s2736_s29 = sphi %s2864_s29, %s3511_s29   ;;  %s2732_s28 = sphi %s2862_s28, %s3510_s28   ;;  %s2728_s27 = sphi %s2860_s27, %s3509_s27   ;;  %s2724_s26 = sphi %s2858_s26, %s3508_s26   ;;  %s2720_s25 = sphi %s2856_s25, %s3507_s25   ;;  %s2716_s24 = sphi %s2854_s24, %s3506_s24   ;;  %s2712_s23 = sphi %s2852_s23, %s3505_s23   ;;  %s2708_s22 = sphi %s2850_s22, %s3504_s22   ;;  %s2704_s21 = sphi %s2848_s21, %s3503_s21  }
  0x19   : > { %3435 = sst [smem:[#allocation13_spill]] %s2708_s22  ;;  %s2193_s18 = sadd.s32 4294967294, %s2744_s0  }
  0x1a   : > { %3436 = sst [smem:[#allocation14_spill]] %s2712_s23  ;;  %s45_s19 = sadd.s32 1, %s2736_s29 }
  0x1b   : > { %3437 = sst [smem:[#allocation15_spill]] %s2716_s24  ;;  %s48_s20 = sadd.s32 1, %s2740_s30 }
  0x1c   : > { %3438 = sst [smem:[#allocation16_spill]] %s2720_s25  ;;  %p46_p0 = scmp.ge.s32.totalorder %s45_s19, 2 }
  0x1d   : > { %3439 = sst [smem:[#allocation17_spill]] %s2724_s26  ;;  %s55_s16 = sadd.s32 1, %s2724_s26 }
  0x1e   : > { %3440 = sst [smem:[#allocation18_spill]] %s2732_s28  ;;  %p62_p1 = scmp.ne.s32.totalorder %s2724_s26, %s2720_s25 }
  0x1f   : > { %3441 = sst [smem:[#allocation19_spill]] %s2736_s29  ;;  %p63_p2 = scmp.eq.s32.totalorder %s2744_s0, 0 }
  0x20   : > { %3442 = sst [smem:[#allocation20_spill]] %s2740_s30  ;;  %s3514_s19 = smov (%p46_p0, %s45_s19), 0 }
  0x21   : > { %3443 = sst [smem:[#allocation21_spill]] %s2744_s0  ;;  %s3516_s20 = smov (!%p46_p0, %s48_s20), %s2740_s30 }
  0x22   : > { %3444 = sst [smem:[#allocation22_spill]] %s3514_s19  ;;  %p2914_p3 = por %p63_p2, %p62_p1 }
  0x23   : > { %p68_p4 = scmp.ne.s32.totalorder %s2720_s25, %s2716_s24  ;;  %p50_p5 = scmp.ge.s32.totalorder %s3516_s20, 2 }
  0x24   : > { %p69_p6 = scmp.eq.s32.totalorder %s2192_s17, 0  ;;  %p2920_p7 = scmp.eq.s32.totalorder %s2192_s17, 3 }
  0x25   : > { %p2924_p8 = scmp.eq.s32.totalorder %s2193_s18, 3  ;;  %s3518_s20 = smov (%p50_p5, %s3516_s20), 0 }
  0x26   : > { %3448 = sst [smem:[#allocation23_spill]] %s3518_s20  ;;  %p2930_p9 = por %p69_p6, %p68_p4 }
  0x27   : > { %p2936_p10 = por %p2920_p7, %p62_p1  ;;  %s52_s18 = ssub.s32 %s2740_s30, %s3518_s20 }
  0x28   : > { %p2944_p11 = por %p2924_p8, %p68_p4  ;;  %p53_p12 = scmp.eq.s32.totalorder %s52_s18, 0 }
  0x29   : > { %s3450_s17 = scalar_select %p2936_p10, 1, 0 }
  0x2a   : > { %s3452_s13 = scalar_select %p2944_p11, 1, 0 }
  0x2b   : > { %3451 = sst [smem:[#allocation24_spill]] %s3450_s17  ;;  %s458_s12 = ssub.s32 %s2736_s29, %s3514_s19 }
  0x2c   : > { %3453 = sst [smem:[#allocation25_spill]] %s3452_s13  ;;  %s460_s11 = sor.u32 %s458_s12, %s52_s18 }
  0x2d   : > { %s463_s10 = sadd.s32 1, %s2712_s23  ;;  %p461_p13 = scmp.eq.s32.totalorder %s460_s11, 0 }
  0x2e   : > { %s2952_s9 = scalar_select %p53_p12, %s2724_s26, %s55_s16  }
  0x2f   : > { %p473_p0 = scmp.ne.s32.totalorder %s2712_s23, %s2708_s22  ;;  %p479_p1 = scmp.ne.s32.totalorder %s2708_s22, %s2704_s21 }
  0x30   : > { %3454 = sst [smem:[#allocation26_spill]] %s2952_s9  ;;  %p2430_p5 = scmp.lt.s32.totalorder %s2744_s0, 4 }
  0x31   : > { %s2959_s17 = scalar_select %p461_p13, %s2712_s23, %s463_s10  }
  0x32   : > { %p2963_p2 = por %p473_p0, %p2920_p7  ;;  %p2969_p4 = por %p479_p1, %p2924_p8 }
  0x33   : > { %3455 = sst [smem:[#allocation27_spill]] %s2959_s17  ;;  %s506_s12 = sand.u32 1, %s2724_s26  }
  0x34   : > { %s3456_s20 = scalar_select %p2963_p2, 1, 0 }
  0x35   : > { %s3458_s19 = scalar_select %p2969_p4, 1, 0 }
  0x36   : > { %3457 = sst [smem:[#allocation28_spill]] %s3456_s20  ;;  %s2196_s16 = sshll.u32 %s506_s12, 3 }
  0x37   : > { %3459 = sst [smem:[#allocation29_spill]] %s3458_s19  ;;  %s2197_s18 = sshll.u32 %s2740_s30, 7 }
  0x38   : > { %s3460_s9 = sld [smem:[#allocation32_spill]]  ;;  %s510_s10 = scalar_lea.vmem [#allocation3], %s2196_s16 }
  0x39   : > { %s517_s28 = sshll.u32 %s510_s10, 4  ;;  %p2985_p6 = pnand %p2430_p5, %p2914_p3  ;;  %s2981_s28 = int_to_ptr.vmem [resolvable:$true] %s517_s28 }
  0x3a   : > { %s507_s29 = scalar_lea.sflag [#allocation4], %s506_s12 }
  0x3b   : > { %p2562_p13 = pneg %p2985_p6 }
  0x3e   : > { %s2979_s21 = scalar_lea.hbm %s3460_s9, %s2197_s18  ;;  %s2565_s15 = scalar_lea.hbm %s3460_s9, 256 }
  0x3f   : > { %s2560_s18 = scalar_lea.hbm %s2979_s21, 128  ;;  %p2566_p3 = scmp.lt.u32.totalorder %s2979_s21, %s3460_s9 }
  0x40   : > { %p2561_p12 = scmp.ne.s32.totalorder %s2979_s21, %s2560_s18  ;;  %p2567_p5 = scmp.lt.u32.totalorder %s2565_s15, %s2560_s18 }
  0x41   : > { %p2569_p8 = scmp.lt.u32.totalorder %s2560_s18, %s2979_s21 }
  0x42   : > { %p2563_p0 = pnand %p2562_p13, %p2561_p12  ;;  %p2568_p7 = por %p2567_p5, %p2566_p3 }
  0x44   : > { %p2564_p1 = pneg %p2563_p0  ;;  %p2570_p4 = por %p2569_p8, %p2568_p7 }
  0x46   : > { %p2571_p11 = pnand %p2570_p4, %p2564_p1 }
  0x48   : > { %2574 = shalt.err (!%p2571_p11)
}
  0x49   : > { %s2575_s12 = scalar_lea.vmem %s2981_s28, 128  ;;  %s2746_s16 = smov [#allocation3]  }
  0x4a   : > { %p2576_p12 = scmp.ne.s32.totalorder %s2981_s28, %s2575_s12  ;;  %s2580_s11 = sshll.u32 %s2746_s16, 4  ;;  %s2581_s11 = int_to_ptr.vmem [resolvable:$false] %s2580_s11 }
  0x4b   : > { %s2582_s30 = scalar_lea.vmem %s2581_s11, 256  ;;  %p2583_p10 = scmp.lt.s32.totalorder %s2981_s28, %s2581_s11 }
  0x4c   : > { %p2578_p0 = pnand %p2576_p12, %p2562_p13  ;;  %p2584_p3 = scmp.lt.s32.totalorder %s2582_s30, %s2575_s12 }
  0x4e   : > { %p2579_p2 = pneg %p2578_p0  ;;  %p2585_p5 = por %p2584_p3, %p2583_p10 }
  0x50   : > { %p2586_p7 = pnand %p2585_p5, %p2579_p2 }
  0x52   : > { %2589 = shalt.err (!%p2586_p7)
}
  0x53   : > { %2422 = dma.hbm_to_vmem [thread:$0]  (!%p2985_p6), %s2979_s21, 128, %s2981_s28, %s507_s29  }
  0x54   : > { %p3462_p11 = scmp.lt.s32.totalorder %s2744_s0, 5  ;;  %p3463_p4 = scmp.ge.s32.totalorder %s2744_s0, 1 }
  0x56   : > { %p603_p8 = pnand %p3463_p4, %p3462_p11 }
  0x58   : > { %606 = sbr.rel (%p603_p8) target bundleno = 3118 (0xc2e), region = 80 }
  0x5f   : > { %s3021_s18 = sand.u32 1, %s2720_s25  }
  0x60   : > { %3464 = sst [smem:[#allocation30_spill]] %s3021_s18  ;;  %s2199_s15 = sshll.u32 %s3021_s18, 3 }
  0x61   : > { %s609_s10 = scalar_lea.sflag [#allocation4], %s3021_s18  ;;  %s612_s12 = scalar_lea.vmem [#allocation3], %s2199_s15 }
  0x62   : > { %2691 = dma.done.wait (%p2930_p9), %s609_s10, 128  }
  0x63   : > { %2693 = vsyncadd (%p2930_p9), %s609_s10, 4294967168  ;;  %s3408_s21 = sand.u32 1, %s2708_s22   ;;  %p710_p10 = scmp.lt.s32.totalorder %s2728_s27, 1 }
  0x64   : > { %s2201_s28 = sshll.u32 %s3408_s21, 5  ;;  %s3465_s3 = sld [smem:[#allocation33_spill]] }
  0x65   : > { %s3034_s14 = scalar_select %p710_p10, %s2728_s27, 1 }
  0x66   : > { %s3466_s5 = sld [smem:[#allocation34_spill]]  ;;  %s3471_s11 = sld [smem:[#allocation38_spill]] }
  0x67   : > { %s2246_s21 = sshll.u32 %s3034_s14, 5  ;;  %s3472_s20 = sld [smem:[#allocation39_spill]] }
  0x68   : > { %s3090_s26 = scalar_lea.vmem [#allocation6], %s2199_s15  ;;  %s3092_s25 = scalar_lea.vmem [#allocation7], %s2201_s28 }
  0x69   : > { %p2210_p9 = scmp.ne.s32.totalorder %s2728_s27, 0 }
  0x6a   : > { %s3052_s17 = scalar_lea.vmem %s3465_s3, %s2246_s21  ;;  %s3469_s3 = sld [smem:[#allocation36_spill]]  ;;  %v759_v0 = vld [vmem:[%s612_s12] sm:$0xff] (!%p2210_p9)  ;;  %vm760_vm0 = vcmask (!%p2210_p9), 261120  }
  0x6b   : > { %761 = vst.msk [vmem:[#allocation2] sm:$0xff] (!%p2210_p9), %vm760_vm0, %v759_v0 }
  0x6c   : > { %s3057_s13 = scalar_lea.vmem %s3466_s5, %s2246_s21  ;;  %s3470_s5 = sld [smem:[#allocation37_spill]] }
  0x6d   : > { %3467 = sst [smem:[#allocation31_spill]] %s3057_s13  ;;  %s2249_s13 = sshll.u32 %s3034_s14, 6 }
  0x6e   : > { %s3084_s6 = scalar_lea.vmem %s3471_s11, %s2249_s13  ;;  %s753_s9 = scalar_lea.vmem %s3472_s20, %s3034_s14 }
  0x6f   : > { %758 = sbr.rel (%p2210_p9) target bundleno = 118 (0x76), region = 88 }
  0x70   : > { %s3074_s22 = scalar_lea.vmem %s3469_s3, %s2246_s21 }
  0x72   : > { %s745_s18 = scalar_lea.vmem %s3470_s5, %s3034_s14 }
  0x76 PF: > { %v3095_v1 = vld [vmem:[#allocation2] sm:$0xff]  ;;  %vm765_vm1 = vcmask 261120   ;;  %v795_v9 = vld [vmem:[%s3052_s17 + $0x8] sm:$0xff]  ;;  %v796_v10 = vld [vmem:[%s3052_s17 + $0x10] sm:$0xff]  ;;  %v2747_v11 = vmov 0.0|0.0   ;;  %vm2748_vm2 = vmmov 0   ;;  %s3473_s13 = scalar_lea.vmem %s3378_s1, %s3034_s14  ;;  %s3474_s15 = scalar_lea.vmem %s3379_s2, %s3034_s14 }
  0x77   : > { %v766_v2 = vsel %vm765_vm1, %v3095_v1, 0.0  ;;  %v794_v8 = vld [vmem:[%s3052_s17] sm:$0xff]  ;;  %2383 = vmatprep.subr.bf16.mxu1 %v2747_v11  ;;  %v797_v13 = vld [vmem:[%s3052_s17 + $0x18] sm:$0xff]  ;;  %v2749_v14 = vmov 0.0   ;;  %s3475_s28 = scalar_lea.vmem %s3381_s4, %s3034_s14  ;;  %s2750_s11 = smov 104   ;;  %vm894_vm3 = vcmask 64512  }
  0x78   : > { %767 = vadd.xlane.f32.xlu0 %v766_v2  ;;  %v2384_v12 = vpack.c.bf16 %v795_v9, %v794_v8  ;;  %2299 = vmatprep.mubr.msk.f32.mxu1 %vm2748_vm2, %v2749_v14  ;;  %v2387_v15 = vpack.c.bf16 %v797_v13, %v796_v10  ;;  %v2211_v20 = vld [vmem:[%s3473_s13] ss:$0 sm:$0xff]  ;;  %s2751_s29 = smov 120   ;;  %s2752_s16 = smov 112   ;;  %vm1566_vm4 = vcmask 130048   ;;  %vm1568_vm5 = vcmask 195584  }
  0x79   : > { %2312 = vmatprep.subr.mxu0 %v2749_v14  ;;  %2314 = vmatprep.mubr.msk.f32.mxu0 %vm2748_vm2, %v2749_v14  ;;  %v2212_v22 = vld [vmem:[%s3474_s15] ss:$0 sm:$0xff]  ;;  %s2753_s23 = smov 96   ;;  %s2754_s19 = smov 64   ;;  %vm1810_vm7 = vcmask 523264  }
  0x7a   : > { %2385 = vmatpush3.bf16.msra.mxu1 %v2384_v12  ;;  %v2213_v25 = vld [vmem:[%s3475_s28] ss:$0 sm:$0xff]  ;;  %s3476_s0 = sld [smem:[#allocation31_spill]]  ;;  %s2755_s24 = smov 8  }
  0x7b   : > { %2386 = vmatprep.subr.bf16.mxu1 %v2747_v11  ;;  %s2756_s10 = smov 16   ;;  %s2757_s30 = smov 24  }
  0x7c   : > { %s3477_s13 = sld [smem:[#allocation35_spill]]  ;;  %s3479_s12 = scalar_lea.vmem %s3384_s7, %s3034_s14 }
  0x7d   : > { %p2235_p2 = scmp.ne.s32.totalorder %s2728_s27, 1 }
  0x7e   : > { %2388 = vmatpush3.bf16.msra.mxu1 %v2387_v15 }
  0x7f   : > { %2302 = vmatprep.subr.mxu1 %v2749_v14 }
  0x82   : > { %s3478_s20 = scalar_lea.vmem %s3477_s13, %s3034_s14 }
 0x105   : > { %v768_v3 = vpop.xlane.xlu0 %767 }
 0x106   : > { %v770_v4 = vmul.f32 0.03125, %v768_v3 }
 0x108   : > { %v771_v5 = vsub.f32 %v3095_v1, %v770_v4 }
 0x10a   : > { %v772_v6 = vmul.f32 %v771_v5, %v771_v5 }
 0x10c   : > { %v773_v7 = vsel %vm765_vm1, %v772_v6, 0.0 }
 0x10d   : > { %774 = vadd.xlane.f32.xlu0 %v773_v7 }
 0x19a   : > { %v775_v16 = vpop.xlane.xlu0 %774 }
 0x19b   : > { %v776_v17 = vmul.f32 0.03125, %v775_v16 }
 0x19d   : > { %v777_v18 = vadd.f32 1e-06, %v776_v17 }
 0x19f   : > { %2534 = vrsqrt.f32 %v777_v18 }
 0x1a9   : > { %v2535_v19 = vpop.eup %2534 }
 0x1aa   : > { %v779_v21 = vmul.f32 %v2535_v19, %v771_v5 }
 0x1ac   : > { %v786_v23 = vmul.f32 %v2211_v20, %v779_v21 }
 0x1ae   : > { %v793_v24 = vadd.f32 %v2212_v22, %v786_v23 }
 0x1b0   : > { %2300 = vmatmul.mubr.msk.f32.vlgmr.msra.gmra.mrb[0].mxu1 %vm765_vm1, %v793_v24 }
 0x1b1   : > { %2304 = vmatprep.mubr.msk.f32.mxu1 %vm2748_vm2, %v2749_v14 }
 0x283   : > { %v874_v26 = vpop.f32.mrb[0].mxu1 }
 0x284   : > { %v875_v27 = vadd.f32 %v2213_v25, %v874_v26  ;;  %v2301_v28 = vpop.f32.mrb[1].mxu1 }
 0x286   : > { %885 = vrot.lane.b32.xlu0 %v875_v27, %s2750_s11  ;;  %879 = vrot.lane.b32.xlu1 %v875_v27, %s2751_s29  ;;  %v888_v33 = vmul.f32 0.35355338, %v875_v27 }
 0x28a   : > { %882 = vrot.lane.b32.xlu1 %v875_v27, %s2752_s16 }
 0x28e   : > { %892 = vrot.lane.b32.xlu1 %v875_v27, %s2753_s23 }
 0x2f8   : > { %v3131_v29 = vpop.permute.xlu1 %879  ;;  %v3137_v31 = vpop.permute.xlu0 %885 }
 0x2f9   : > { %970 = vrot.lane.b32.xlu1 %v3131_v29, %s2753_s23  ;;  %v889_v35 = vmul.f32 0.35355338, %v3131_v29  ;;  %v891_v39 = vmul.f32 0.35355338, %v3137_v31 }
 0x2fc   : > { %v3134_v30 = vpop.permute.xlu1 %882 }
 0x2fd   : > { %1047 = vrot.lane.b32.xlu1 %v3134_v30, %s2753_s23  ;;  %v890_v37 = vmul.f32 0.35355338, %v3134_v30 }
 0x300   : > { %v893_v32 = vpop.permute.xlu1 %892 }
 0x301   : > { %1124 = vrot.lane.b32.xlu1 %v3137_v31, %s2753_s23  ;;  %2303 = vmatpush3.xpose.msk.msra.mxu1 %vm894_vm3, %v893_v32  ;;  %v1572_v32 = vld [vmem:[%s3476_s0 + $0x10] sm:$0xff] }
 0x302   : > { %2307 = vmatprep.subr.mxu1 %v2749_v14 }
 0x304   : > { %2305 = vmatmul.mubr.msk.f32.vlgmr.msra.gmra.mrb[2].mxu1 %vm894_vm3, %v888_v33  ;;  %v1573_v33 = vld [vmem:[%s3476_s0 + $0x18] sm:$0xff] }
 0x305   : > { %2309 = vmatprep.mubr.msk.f32.mxu1 %vm2748_vm2, %v2749_v14 }
 0x36b   : > { %v971_v34 = vpop.permute.xlu1 %970 }
 0x36c   : > { %2308 = vmatpush3.xpose.msk.msra.mxu1 %vm894_vm3, %v971_v34  ;;  %v2393_v34 = vpack.c.bf16 %v1573_v33, %v1572_v32 }
 0x36d   : > { %2317 = vmatprep.subr.mxu1 %v2749_v14 }
 0x36f   : > { %v1048_v36 = vpop.permute.xlu1 %1047  ;;  %2310 = vmatmul.mubr.msk.f32.vlgmr.msra.gmra.mrb[4].mxu1 %vm894_vm3, %v889_v35 }
 0x370   : > { %2313 = vmatpush3.xpose.msk.msra.mxu0 %vm894_vm3, %v1048_v36  ;;  %2319 = vmatprep.mubr.msk.f32.mxu1 %vm2748_vm2, %v2749_v14 }
 0x371   : > { %2322 = vmatprep.subr.mxu0 %v2749_v14 }
 0x373   : > { %2315 = vmatmul.mubr.msk.f32.vlgmr.msra.gmra.mrb[0].mxu0 %vm894_vm3, %v890_v37  ;;  %v1125_v38 = vpop.permute.xlu1 %1124 }
 0x374   : > { %2318 = vmatpush3.xpose.msk.msra.mxu1 %vm894_vm3, %v1125_v38  ;;  %2324 = vmatprep.mubr.msk.f32.mxu0 %vm2748_vm2, %v2749_v14 }
 0x375   : > { %2327 = vmatprep.subr.mxu1 %v2749_v14 }
 0x377   : > { %2320 = vmatmul.mubr.msk.f32.vlgmr.msra.gmra.mrb[6].mxu1 %vm894_vm3, %v891_v39 }
 0x378   : > { %2329 = vmatprep.mubr.msk.f32.mxu1 %vm2748_vm2, %v2749_v14 }
 0x3d7   : > { %v966_v40 = vpop.f32.mrb[2].mxu1 }
 0x3d8   : > { %v2306_v41 = vpop.f32.mrb[3].mxu1  ;;  %v1201_v42 = vsel %vm894_vm3, %v966_v40, -inf }
 0x3d9   : > { %1202 = vmax.xlane.f32.xlu1 %v1201_v42 }
 0x442   : > { %v1043_v43 = vpop.f32.mrb[4].mxu1 }
 0x443   : > { %v2311_v44 = vpop.f32.mrb[5].mxu1  ;;  %v1204_v45 = vsel %vm894_vm3, %v1043_v43, -inf }
 0x444   : > { %1205 = vmax.xlane.f32.xlu0 %v1204_v45 }
 0x446   : > { %v1120_v46 = vpop.f32.mrb[0].mxu0 }
 0x447   : > { %v2316_v47 = vpop.f32.mrb[1].mxu0  ;;  %v1207_v48 = vsel %vm894_vm3, %v1120_v46, -inf }
 0x448   : > { %1208 = vmax.xlane.f32.xlu1 %v1207_v48  ;;  %v2227_v47 = vld [vmem:[%s3478_s20] ss:$0 sm:$0xff] }
 0x44a   : > { %v1197_v49 = vpop.f32.mrb[6].mxu1 }
 0x44b   : > { %v2321_v50 = vpop.f32.mrb[7].mxu1  ;;  %v1210_v51 = vsel %vm894_vm3, %v1197_v49, -inf }
 0x44c   : > { %1211 = vmax.xlane.f32.xlu0 %v1210_v51 }
 0x459   : > { %1249 = vrot.lane.b32.xlu1 %v875_v27, %s2754_s19 }
 0x466   : > { %v1203_v52 = vpop.xlane.xlu1 %1202 }
 0x467   : > { %v1213_v53 = vsub.f32 %v966_v40, %v1203_v52 }
 0x469   : > { %v1217_v54 = vmul.f32 1.442695, %v1213_v53 }
 0x46b   : > { %2536 = vpow2.f32 %v1217_v54 }
 0x475   : > { %v2537_v55 = vpop.eup %2536 }
 0x476   : > { %v1225_v56 = vsel %vm894_vm3, %v2537_v55, 0.0 }
 0x47d   : > { %1226 = vadd.xlane.f32.xlu1 %v1225_v56 }
 0x4d1   : > { %v1206_v57 = vpop.xlane.xlu0 %1205 }
 0x4d2   : > { %v1214_v58 = vsub.f32 %v1043_v43, %v1206_v57  ;;  %v1684_v57 = vld [vmem:[%s3074_s22] sm:$0xff] }
 0x4d4   : > { %v1219_v59 = vmul.f32 1.442695, %v1214_v58  ;;  %v1685_v58 = vld [vmem:[%s3074_s22 + $0x8] sm:$0xff] }
 0x4d5   : > { %v1209_v60 = vpop.xlane.xlu1 %1208 }
 0x4d6   : > { %2538 = vpow2.f32 %v1219_v59  ;;  %v1215_v61 = vsub.f32 %v1120_v46, %v1209_v60  ;;  %v2396_v59 = vpack.c.bf16 %v1685_v58, %v1684_v57  ;;  %v1687_v60 = vld [vmem:[%s3074_s22 + $0x18] sm:$0xff] }
 0x4d8   : > { %v1221_v62 = vmul.f32 1.442695, %v1215_v61 }
 0x4d9   : > { %v1250_v63 = vpop.permute.xlu1 %1249  ;;  %v1212_v0 = vpop.xlane.xlu0 %1211 }
 0x4da   : > { %2540 = vpow2.f32 %v1221_v62  ;;  %v1216_v2 = vsub.f32 %v1197_v49, %v1212_v0  ;;  %2323 = vmatpush3.msra.mxu0 %v1250_v63 }
 0x4db   : > { %2332 = vmatprep.subr.mxu0 %v2749_v14 }
 0x4dc   : > { %v1223_v3 = vmul.f32 1.442695, %v1216_v2 }
 0x4de   : > { %2542 = vpow2.f32 %v1223_v3  ;;  %v2229_v3 = vld [vmem:[%s3479_s12] ss:$0 sm:$0xff] }
 0x4e0   : > { %v2539_v4 = vpop.eup %2538 }
 0x4e1   : > { %v1228_v5 = vsel %vm894_vm3, %v2539_v4, 0.0 }
 0x4e2   : > { %1229 = vadd.xlane.f32.xlu0 %v1228_v5 }
 0x4e4   : > { %v2541_v6 = vpop.eup %2540 }
 0x4e5   : > { %v1231_v7 = vsel %vm894_vm3, %v2541_v6, 0.0 }
 0x4e6   : > { %1232 = vadd.xlane.f32.xlu1 %v1231_v7 }
 0x4e8   : > { %v2543_v8 = vpop.eup %2542 }
 0x4e9   : > { %v1234_v9 = vsel %vm894_vm3, %v2543_v8, 0.0 }
 0x4ea   : > { %1235 = vadd.xlane.f32.xlu0 %v1234_v9  ;;  %v1689_v9 = vld [vmem:[%s3084_s6 + $0x8] sm:$0xff] }
 0x4f7   : > { %1401 = vrot.lane.b32.xlu1 %v3134_v30, %s2754_s19  ;;  %v1571_v30 = vld [vmem:[%s3476_s0 + $0x8] sm:$0xff] }
 0x4fb   : > { %1477 = vrot.lane.b32.xlu1 %v3137_v31, %s2754_s19 }
 0x500   : > { %1325 = vrot.lane.b32.xlu0 %v3131_v29, %s2754_s19  ;;  %v1570_v29 = vld [vmem:[%s3476_s0] sm:$0xff]  ;;  %s3483_s19 = sld [smem:[#allocation40_spill]] (!%p2235_p2) }
 0x501   : > { %v2390_v31 = vpack.c.bf16 %v1571_v30, %v1570_v29 }
 0x50a   : > { %v1227_v10 = vpop.xlane.xlu1 %1226 }
 0x50b   : > { %2544 = vrcp.f32 %v1227_v10 }
 0x515   : > { %v2545_v12 = vpop.eup %2544 }
 0x516   : > { %v1241_v13 = vmul.f32 %v2545_v12, %v2537_v55  ;;  %v1690_v12 = vld [vmem:[%s3084_s6 + $0x10] sm:$0xff] }
 0x518   : > { %1245 = vst.msk [vmem:[%s3092_s25] sm:$0xff] %vm894_vm3, %v1241_v13  ;;  %2325 = vmatmul.mubr.msk.f32.vlgmr.msra.gmra.mrb[2].mxu0 %vm894_vm3, %v1241_v13  ;;  %v1691_v13 = vld [vmem:[%s3084_s6 + $0x18] sm:$0xff] }
 0x519   : > { %2334 = vmatprep.mubr.msk.f32.mxu0 %vm2748_vm2, %v2749_v14 }
 0x56f   : > { %v1230_v15 = vpop.xlane.xlu0 %1229 }
 0x570   : > { %2546 = vrcp.f32 %v1230_v15  ;;  %v2405_v15 = vpack.c.bf16 %v1691_v13, %v1690_v12 }
 0x573   : > { %v1233_v16 = vpop.xlane.xlu1 %1232 }
 0x574   : > { %2548 = vrcp.f32 %v1233_v16  ;;  %v1692_v16 = vld [vmem:[%s3084_s6 + $0x20] sm:$0xff] }
 0x577   : > { %v1402_v17 = vpop.permute.xlu1 %1401  ;;  %v1236_v18 = vpop.xlane.xlu0 %1235 }
 0x578   : > { %2550 = vrcp.f32 %v1236_v18  ;;  %2333 = vmatpush3.msra.mxu0 %v1402_v17  ;;  %v1693_v17 = vld [vmem:[%s3084_s6 + $0x28] sm:$0xff] }
 0x579   : > { %2389 = vmatprep.subr.bf16.mxu0 %v2747_v11  ;;  %v2408_v18 = vpack.c.bf16 %v1693_v17, %v1692_v16 }
 0x57a   : > { %v2547_v19 = vpop.eup %2546 }
 0x57b   : > { %v1242_v20 = vmul.f32 %v2547_v19, %v2539_v4  ;;  %v1326_v21 = vpop.permute.xlu0 %1325  ;;  %v1478_v22 = vpop.permute.xlu1 %1477  ;;  %v1694_v19 = vld [vmem:[%s3084_s6 + $0x30] sm:$0xff] }
 0x57c   : > { %2328 = vmatpush3.msra.mxu1 %v1326_v21 }
 0x57d   : > { %1246 = vst.msk [vmem:[%s3092_s25 + $0x8] sm:$0xff] %vm894_vm3, %v1242_v20  ;;  %2330 = vmatmul.mubr.msk.f32.vlgmr.msra.gmra.mrb[8].mxu1 %vm894_vm3, %v1242_v20  ;;  %2337 = vmatprep.subr.mxu1 %v2749_v14  ;;  %v1695_v20 = vld [vmem:[%s3084_s6 + $0x38] sm:$0xff] }
 0x57e   : > { %v2549_v23 = vpop.eup %2548  ;;  %2338 = vmatpush3.msra.mxu1 %v1478_v22  ;;  %2339 = vmatprep.mubr.msk.f32.mxu1 %vm2748_vm2, %v2749_v14  ;;  %v2411_v21 = vpack.c.bf16 %v1695_v20, %v1694_v19  ;;  %v2231_v22 = vld [vmem:[%s745_s18] ss:$0 sm:$0xff] }
 0x57f   : > { %v1243_v24 = vmul.f32 %v2549_v23, %v2541_v6  ;;  %2395 = vmatprep.subr.bf16.mxu1 %v2747_v11 }
 0x581   : > { %1247 = vst.msk [vmem:[%s3092_s25 + $0x10] sm:$0xff] %vm894_vm3, %v1243_v24  ;;  %2335 = vmatmul.mubr.msk.f32.vlgmr.msra.gmra.mrb[4].mxu0 %vm894_vm3, %v1243_v24 }
 0x582   : > { %v2551_v25 = vpop.eup %2550  ;;  %2350 = vmatprep.mubr.msk.f32.mxu0 %vm2748_vm2, %v2749_v14  ;;  %2391 = vmatpush3.bf16.msra.mxu0 %v2390_v31 }
 0x583   : > { %v1244_v26 = vmul.f32 %v2551_v25, %v2543_v8  ;;  %2392 = vmatprep.subr.bf16.mxu0 %v2747_v11  ;;  %v1688_v8 = vld [vmem:[%s3084_s6] sm:$0xff] }
 0x584   : > { %v2402_v10 = vpack.c.bf16 %v1689_v9, %v1688_v8 }
 0x585   : > { %1248 = vst.msk [vmem:[%s3092_s25 + $0x18] sm:$0xff] %vm894_vm3, %v1244_v26  ;;  %2340 = vmatmul.mubr.msk.f32.vlgmr.msra.gmra.mrb[10].mxu1 %vm894_vm3, %v1244_v26 }
 0x586   : > { %2361 = vmatprep.mubr.msk.f32.mxu1 %vm2748_vm2, %v2749_v14  ;;  %2394 = vmatpush3.bf16.msra.mxu0 %v2393_v34 }
 0x587   : > { %2401 = vmatprep.subr.bf16.mxu0 %v2747_v11  ;;  %2397 = vmatpush3.bf16.msra.mxu1 %v2396_v59 }
 0x588   : > { %2398 = vmatprep.subr.bf16.mxu1 %v2747_v11 }
 0x5eb   : > { %v1321_v27 = vpop.f32.mrb[2].mxu0 }
 0x5ec   : > { %v2326_v28 = vpop.f32.mrb[3].mxu0 }
 0x650   : > { %v1397_v35 = vpop.f32.mrb[8].mxu1 }
 0x651   : > { %1554 = vrot.lane.b32.xlu0 %v1397_v35, %s2755_s24  ;;  %v2331_v36 = vpop.f32.mrb[9].mxu1 }
 0x654   : > { %v1473_v37 = vpop.f32.mrb[4].mxu0 }
 0x655   : > { %1558 = vrot.lane.b32.xlu1 %v1473_v37, %s2756_s10  ;;  %v2336_v38 = vpop.f32.mrb[5].mxu0 }
 0x658   : > { %v1549_v39 = vpop.f32.mrb[10].mxu1 }
 0x659   : > { %1562 = vrot.lane.b32.xlu0 %v1549_v39, %s2757_s30  ;;  %v2341_v40 = vpop.f32.mrb[11].mxu1  ;;  %s3484_s30 = sld [smem:[#allocation41_spill]] (!%p2235_p2) }
 0x6c3   : > { %v1555_v41 = vpop.permute.xlu0 %1554 }
 0x6c4   : > { %v1565_v43 = vsel %vm894_vm3, %v1321_v27, %v1555_v41 }
 0x6c7   : > { %v1559_v42 = vpop.permute.xlu1 %1558 }
 0x6c8   : > { %v1567_v44 = vsel %vm1566_vm4, %v1565_v43, %v1559_v42 }
 0x6cb   : > { %v1563_v45 = vpop.permute.xlu0 %1562 }
 0x6cc   : > { %v1569_v46 = vsel %vm1568_vm5, %v1567_v44, %v1563_v45  ;;  %v2758_v45 = vmov -1.0  }
 0x6cd   : > { %2351 = vmatmul.mubr.msk.f32.vlgmr.msra.gmra.mrb[6].mxu0 %vm765_vm1, %v1569_v46 }
 0x6ce   : > { %2380 = vmatprep.mubr.msk.f32.mxu0 %vm2748_vm2, %v2749_v14  ;;  %2403 = vmatpush3.bf16.msra.mxu0 %v2402_v10 }
 0x6cf   : > { %2404 = vmatprep.subr.bf16.mxu0 %v2747_v11 }
 0x6d2   : > { %2406 = vmatpush3.bf16.msra.mxu0 %v2405_v15 }
 0x6d3   : > { %2407 = vmatprep.subr.bf16.mxu0 %v2747_v11 }
 0x6d6   : > { %2409 = vmatpush3.bf16.msra.mxu0 %v2408_v18 }
 0x6d7   : > { %2410 = vmatprep.subr.bf16.mxu0 %v2747_v11 }
 0x6da   : > { %2412 = vmatpush3.bf16.msra.mxu0 %v2411_v21 }
 0x7a0   : > { %v1650_v48 = vpop.f32.mrb[6].mxu0 }
 0x7a1   : > { %v1651_v49 = vadd.f32 %v2227_v47, %v1650_v48  ;;  %v2352_v50 = vpop.f32.mrb[7].mxu0 }
 0x7a3   : > { %v3219_v51 = vadd.f32 %v1651_v49, %v3095_v1  ;;  %v1686_v1 = vld [vmem:[%s3074_s22 + $0x10] sm:$0xff]  ;;  %s3480_s22 = scalar_lea.vmem %s3385_s8, %s3034_s14 }
 0x7a4   : > { %v2399_v61 = vpack.c.bf16 %v1687_v60, %v1686_v1  ;;  %v2230_v5 = vld [vmem:[%s3480_s22] ss:$0 sm:$0xff] }
 0x7a5   : > { %v1657_v52 = vsel %vm765_vm1, %v3219_v51, 0.0 }
 0x7a6   : > { %1658 = vadd.xlane.f32.xlu1 %v1657_v52  ;;  %2400 = vmatpush3.bf16.msra.mxu1 %v2399_v61  ;;  %v2233_v52 = vld [vmem:[%s753_s9] ss:$0 sm:$0xff] }
 0x833   : > { %v1659_v53 = vpop.xlane.xlu1 %1658 }
 0x834   : > { %v1660_v54 = vmul.f32 0.03125, %v1659_v53 }
 0x836   : > { %v1661_v14 = vsub.f32 %v3219_v51, %v1660_v54 }
 0x838   : > { %v1662_v55 = vmul.f32 %v1661_v14, %v1661_v14 }
 0x83a   : > { %v1663_v56 = vsel %vm765_vm1, %v1662_v55, 0.0 }
 0x83b   : > { %1664 = vadd.xlane.f32.xlu0 %v1663_v56 }
 0x8c8   : > { %v1665_v62 = vpop.xlane.xlu0 %1664 }
 0x8c9   : > { %v1666_v63 = vmul.f32 0.03125, %v1665_v62 }
 0x8cb   : > { %v1667_v0 = vadd.f32 1e-06, %v1666_v63 }
 0x8cd   : > { %2552 = vrsqrt.f32 %v1667_v0  ;;  %v2236_v0 = vld [vmem:[%s3483_s19] ss:$0 sm:$0xff] (!%p2235_p2) }
 0x8d7   : > { %v2553_v2 = vpop.eup %2552 }
 0x8d8   : > { %v1669_v4 = vmul.f32 %v2553_v2, %v1661_v14 }
 0x8da   : > { %v1676_v6 = vmul.f32 %v2229_v3, %v1669_v4  ;;  %v2237_v3 = vld [vmem:[%s3484_s30] ss:$0 sm:$0xff] (!%p2235_p2) }
 0x8dc   : > { %v1683_v7 = vadd.f32 %v2230_v5, %v1676_v6 }
 0x8de   : > { %2362 = vmatmul.mubr.msk.f32.vlgmr.msra.gmra.mrb[12].mxu1 %vm765_vm1, %v1683_v7 }
 0x9b1   : > { %v1772_v23 = vpop.f32.mrb[12].mxu1 }
 0x9b2   : > { %v1773_v24 = vadd.f32 %v2231_v22, %v1772_v23  ;;  %v2363_v25 = vpop.f32.mrb[13].mxu1 }
 0x9b4   : > { %v1777_v26 = vmul.f32 0.70710677, %v1773_v24  ;;  %v1776_v48 = vmul.f32 0.5, %v1773_v24 }
 0x9b6   : > { %v1780_v27 = vand.u32 2147483647, %v1777_v26  ;;  %vm1778_vm6 = vcmp.ge.f32.partialorder %v1777_v26, 0.0 }
 0x9b7   : > { %v1779_v46 = vsel %vm1778_vm6, 1.0, %v2758_v45 }
 0x9b8   : > { %v1781_v28 = vmul.f32 0.3275911, %v1780_v27  ;;  %v1794_v30 = vsub.f32 0.0, %v1780_v27 }
 0x9ba   : > { %v1782_v29 = vadd.f32 1.0, %v1781_v28  ;;  %v1795_v11 = vmul.f32 %v1794_v30, %v1780_v27 }
 0x9bc   : > { %2554 = vrcp.f32 %v1782_v29  ;;  %v1796_v34 = vmul.f32 1.442695, %v1795_v11 }
 0x9be   : > { %2556 = vpow2.f32 %v1796_v34 }
 0x9c6   : > { %v2555_v31 = vpop.eup %2554 }
 0x9c7   : > { %v1785_v32 = vmul.f32 1.0614054, %v2555_v31 }
 0x9c8   : > { %v2557_v42 = vpop.eup %2556 }
 0x9c9   : > { %v1786_v33 = vadd.f32 -1.4531521, %v1785_v32 }
 0x9cb   : > { %v1787_v35 = vmul.f32 %v2555_v31, %v1786_v33 }
 0x9cd   : > { %v1788_v36 = vadd.f32 1.4214138, %v1787_v35 }
 0x9cf   : > { %v1789_v37 = vmul.f32 %v2555_v31, %v1788_v36 }
 0x9d1   : > { %v1790_v38 = vadd.f32 -0.28449672, %v1789_v37 }
 0x9d3   : > { %v1791_v39 = vmul.f32 %v2555_v31, %v1790_v38 }
 0x9d5   : > { %v1792_v40 = vadd.f32 0.2548296, %v1791_v39 }
 0x9d7   : > { %v1793_v41 = vmul.f32 %v2555_v31, %v1792_v40 }
 0x9d9   : > { %v1798_v43 = vmul.f32 %v2557_v42, %v1793_v41 }
 0x9db   : > { %v1799_v44 = vsub.f32 1.0, %v1798_v43 }
 0x9dd   : > { %v1800_v47 = vmul.f32 %v1799_v44, %v1779_v46 }
 0x9df   : > { %v1801_v49 = vadd.f32 1.0, %v1800_v47 }
 0x9e1   : > { %v1802_v50 = vmul.f32 %v1801_v49, %v1776_v48 }
 0x9e3   : > { %2381 = vmatmul.mubr.msk.f32.vlgmr.msra.gmra.mrb[8].mxu0 %vm1810_vm7, %v1802_v50 }
 0xab5   : > { %1889 = sbr.rel (%p2235_p2) target bundleno = 3061 (0xbf5), region = 92 }
 0xab6   : > { %v1880_v53 = vpop.f32.mrb[8].mxu0 }
 0xab7   : > { %v1881_v54 = vadd.f32 %v2233_v52, %v1880_v53  ;;  %v2382_v14 = vpop.f32.mrb[9].mxu0 }
 0xab9   : > { %v1884_v55 = vadd.f32 %v1881_v54, %v3219_v51 }
 0xabb   : > { %1885 = vst.msk [vmem:[#allocation2] sm:$0xff] %vm765_vm1, %v1884_v55  ;;  %v1892_v56 = vsel (!%p2235_p2), %vm765_vm1, %v1884_v55, 0.0 }
 0xabc   : > { %1893 = vadd.xlane.f32.xlu0 %v1892_v56 }
 0xb49   : > { %v1894_v57 = vpop.xlane.xlu0 %1893 }
 0xb4a   : > { %v1895_v58 = vmul.f32 0.03125, %v1894_v57 }
 0xb4c   : > { %v1896_v59 = vsub.f32 %v1884_v55, %v1895_v58 }
 0xb4e   : > { %v1897_v1 = vmul.f32 %v1896_v59, %v1896_v59 }
 0xb50   : > { %v1898_v60 = vsel %vm765_vm1, %v1897_v1, 0.0 }
 0xb51   : > { %1899 = vadd.xlane.f32.xlu0 %v1898_v60 }
 0xbde   : > { %v1900_v61 = vpop.xlane.xlu0 %1899 }
 0xbdf   : > { %v1901_v62 = vmul.f32 0.03125, %v1900_v61 }
 0xbe1   : > { %v1902_v63 = vadd.f32 1e-06, %v1901_v62 }
 0xbe3   : > { %2558 = vrsqrt.f32 %v1902_v63 }
 0xbed   : > { %v2559_v51 = vpop.eup %2558 }
 0xbee   : > { %v1904_v2 = vmul.f32 %v2559_v51, %v1896_v59 }
 0xbf0   : > { %v1911_v4 = vmul.f32 %v2236_v0, %v1904_v2 }
 0xbf2   : > { %v1918_v5 = vadd.f32 %v2237_v3, %v1911_v4 }
 0xbf4   : > { %1919 = vst.msk [vmem:[%s3090_s26] sm:$0xff] %vm765_vm1, %v1918_v5 }
 0xbf5 PF: > { %s3485_s3 = sld [smem:[#allocation18_spill]]  ;;  %s3486_s5 = sld [smem:[#allocation30_spill]] }
 0xbf6   : > { %s3487_s13 = sld [smem:[#allocation24_spill]]  ;;  %s1939_s28 = sshll.u32 %s3090_s26, 4  ;;  %s1940_s28 = int_to_ptr.vmem [resolvable:$true] %s1939_s28 }
 0xbf7   : > { %s3488_s12 = sld [smem:[#allocation42_spill]]  ;;  %s2590_s11 = scalar_lea.vmem %s1940_s28, 128 }
 0xbf8   : > { %p2591_p6 = scmp.ne.s32.totalorder %s1940_s28, %s2590_s11  ;;  %s2759_s29 = smov [#allocation6]  }
 0xbf9   : > { %s2594_s16 = sshll.u32 %s2759_s29, 4  ;;  %s2595_s16 = int_to_ptr.vmem [resolvable:$false] %s2594_s16 }
 0xbfa   : > { %s2596_s6 = scalar_lea.vmem %s2595_s16, 256  ;;  %p2597_p0 = scmp.lt.s32.totalorder %s1940_s28, %s2595_s16 }
 0xbfb   : > { %s2240_s20 = sshll.u32 %s3485_s3, 7  ;;  %s1921_s22 = scalar_lea.sflag [#allocation5], %s3486_s5 }
 0xbfc   : > { %p3489_p13 = scmp.ne.s32.totalorder %s3487_s13, 0  ;;  %p2598_p3 = scmp.lt.s32.totalorder %s2596_s6, %s2590_s11 }
 0xbfd   : > { %s3279_s21 = scalar_lea.hbm %s3488_s12, %s2240_s20 }
 0xbfe   : > { %p2592_p1 = pnand %p2591_p6, %p3489_p13  ;;  %p2599_p5 = por %p2598_p3, %p2597_p0 }
 0xc00   : > { %p2593_p12 = pneg %p2592_p1 }
 0xc02   : > { %p2600_p7 = pnand %p2599_p5, %p2593_p12 }
 0xc04   : > { %2603 = shalt.err (!%p2600_p7)
}
 0xc05   : > { %s2604_s26 = scalar_lea.hbm %s3279_s21, 128  ;;  %s2608_s14 = scalar_lea.hbm %s3488_s12, 256 }
 0xc06   : > { %p2605_p11 = scmp.ne.s32.totalorder %s3279_s21, %s2604_s26  ;;  %p2609_p10 = scmp.lt.u32.totalorder %s3279_s21, %s3488_s12 }
 0xc07   : > { %p2610_p9 = scmp.lt.u32.totalorder %s2608_s14, %s2604_s26  ;;  %p2612_p6 = scmp.lt.u32.totalorder %s2604_s26, %s3279_s21 }
 0xc08   : > { %p2606_p4 = pnand %p2605_p11, %p3489_p13 }
 0xc09   : > { %p2611_p2 = por %p2610_p9, %p2609_p10 }
 0xc0a   : > { %p2607_p8 = pneg %p2606_p4 }
 0xc0b   : > { %p2613_p1 = por %p2612_p6, %p2611_p2 }
 0xc0d   : > { %p2614_p12 = pnand %p2613_p1, %p2607_p8 }
 0xc0f   : > { %2617 = shalt.err (!%p2614_p12)
}
 0xc10   : > { %s3490_s0 = sld [smem:[#allocation13_spill]]  ;;  %s2250_s30 = sshll.u32 %s2728_s27, 3 }
 0xc11   : > { %s3491_s10 = sld [smem:[#allocation28_spill]]  ;;  %s1954_s5 = sshll.u32 %s3092_s25, 4  ;;  %s3303_s5 = int_to_ptr.vmem [resolvable:$true] %s1954_s5 }
 0xc12   : > { %2415 = dma.vmem_to_hbm [thread:$0]  (%p3489_p13), %s1940_s28, 128, %s3279_s21, %s1921_s22  }
 0xc13   : > { %s1951_s20 = sadd.s32 %s3485_s3, %s2250_s30  ;;  %s3492_s29 = sld [smem:[#allocation43_spill]] }
 0xc14   : > { %s2243_s17 = sshll.u32 %s1951_s20, 7  ;;  %s2618_s18 = scalar_lea.vmem %s3303_s5, 512 }
 0xc15   : > { %p2619_p0 = scmp.ne.s32.totalorder %s3303_s5, %s2618_s18  ;;  %s2760_s25 = smov [#allocation7]  }
 0xc16   : > { %s3494_s6 = sand.u32 1, %s3490_s0   ;;  %s2622_s27 = sshll.u32 %s2760_s25, 4  ;;  %s2623_s27 = int_to_ptr.vmem [resolvable:$false] %s2622_s27 }
 0xc17   : > { %s3312_s26 = scalar_lea.sflag [#allocation8], %s3494_s6  ;;  %p3495_p13 = scmp.ne.s32.totalorder %s3491_s10, 0 }
 0xc18   : > { %s2624_s3 = scalar_lea.vmem %s2623_s27, 1024  ;;  %p2625_p7 = scmp.lt.s32.totalorder %s3303_s5, %s2623_s27 }
 0xc19   : > { %s3493_s16 = smov %s3492_s29  ;;  %s3308_s13 = scalar_lea.hbm %s3492_s29, %s2243_s17 }
 0xc1a   : > { %p2620_p3 = pnand %p2619_p0, %p3495_p13  ;;  %p2626_p11 = scmp.lt.s32.totalorder %s2624_s3, %s2618_s18 }
 0xc1c   : > { %p2621_p5 = pneg %p2620_p3  ;;  %p2627_p4 = por %p2626_p11, %p2625_p7 }
 0xc1e   : > { %p2628_p8 = pnand %p2627_p4, %p2621_p5 }
 0xc20   : > { %2631 = shalt.err (!%p2628_p8)
}
 0xc21   : > { %s2632_s21 = scalar_lea.hbm %s3308_s13, 512  ;;  %s2636_s23 = scalar_lea.hbm %s3493_s16, 2048 }
 0xc22   : > { %p2633_p10 = scmp.ne.s32.totalorder %s3308_s13, %s2632_s21  ;;  %p2637_p6 = scmp.lt.u32.totalorder %s3308_s13, %s3493_s16 }
 0xc23   : > { %p2638_p1 = scmp.lt.u32.totalorder %s2636_s23, %s2632_s21  ;;  %p2640_p0 = scmp.lt.u32.totalorder %s2632_s21, %s3308_s13 }
 0xc24   : > { %p2634_p9 = pnand %p2633_p10, %p3495_p13 }
 0xc25   : > { %p2639_p12 = por %p2638_p1, %p2637_p6 }
 0xc26   : > { %p2635_p2 = pneg %p2634_p9 }
 0xc27   : > { %p2641_p3 = por %p2640_p0, %p2639_p12 }
 0xc29   : > { %p2642_p5 = pnand %p2641_p3, %p2635_p2 }
 0xc2b   : > { %2645 = shalt.err (!%p2642_p5)
}
 0xc2c   : > { %s2761_s19 = smov 128   ;;  %s2762_s0 = smov 256  }
 0xc2d   : > { %2416 = dma.vmem_to_hbm [thread:$0]  (%p3495_p13), %s3303_s5, 512, %s3308_s13, %s3312_s26, %s2761_s19, %s2762_s0, %s2755_s24  }
 0xc2e PF: > { %s3496_s30 = sld [smem:[#allocation21_spill]]  ;;  %s3497_s20 = sld [smem:[#allocation15_spill]] }
 0xc2f   : > { %s3498_s17 = sld [smem:[#allocation25_spill]] }
 0xc34   : > { %p2431_p7 = scmp.ge.s32.totalorder %s3496_s30, 2  ;;  %s1969_s15 = sand.u32 1, %s3497_s20  }
 0xc35   : > { %p3499_p11 = scmp.ne.s32.totalorder %s3498_s17, 0  ;;  %s1970_s11 = scalar_lea.sflag [#allocation5], %s1969_s15 }
 0xc37   : > { %p2424_p4 = pnand %p2431_p7, %p3499_p11 }
 0xc39   : > { %2695 = dma.done.wait (!%p2424_p4), %s1970_s11, 128  }
 0xc3a   : > { %2697 = vsyncadd (!%p2424_p4), %s1970_s11, 4294967168  ;;  %s3500_s29 = sld [smem:[#allocation12_spill]]  ;;  %s3501_s6 = sld [smem:[#allocation29_spill]] }
 0xc40   : > { %s1978_s18 = sand.u32 1, %s3500_s29   ;;  %p3502_p8 = scmp.ne.s32.totalorder %s3501_s6, 0 }
 0xc41   : > { %s1979_s25 = scalar_lea.sflag [#allocation8], %s1978_s18 }
 0xc42   : > { %p2427_p10 = pnand %p2431_p7, %p3502_p8 }
 0xc44   : > { %2699 = dma.done.wait (!%p2427_p10), %s1979_s25, 512  }
 0xc45   : > { %2701 = vsyncadd (!%p2427_p10), %s1979_s25, 4294966784  ;;  %s36_s0 = sadd.s32 1, %s3496_s30   ;;  %s3503_s21 = sld [smem:[#allocation13_spill]] }
 0xc46   : > { %p33_p13 = scmp.ge.s32.totalorder %s36_s0, 6   ;;  %s3504_s22 = sld [smem:[#allocation14_spill]] }
 0xc47   : > { %s3505_s23 = sld [smem:[#allocation27_spill]]  ;;  %s3506_s24 = sld [smem:[#allocation16_spill]] }
 0xc48   : > { %s3507_s25 = sld [smem:[#allocation17_spill]]  ;;  %s3508_s26 = sld [smem:[#allocation26_spill]] }
 0xc49   : > { %s3509_s27 = sld [smem:[#allocation19_spill]]  ;;  %s3510_s28 = sld [smem:[#allocation20_spill]] }
 0xc4a   : > { %s3511_s29 = sld [smem:[#allocation22_spill]]  ;;  %s3512_s30 = sld [smem:[#allocation23_spill]] }
 0xc4b   :  { %35 = sbr.rel (!%p33_p13) target bundleno = 24 (0x18), region = 186 }
 0xc52   :  { %1984 = vsyncpa [#allocation4], 1 }
 0xc53   :  { %1986 = vsyncpa [#allocation4 + $0x1], 1 }
 0xc54   :  { %1987 = vsyncpa [#allocation5], 1 }
 0xc55   :  { %1989 = vsyncpa [#allocation5 + $0x1], 1 }
 0xc56   :  { %1990 = vsyncpa [#allocation8], 1 }
 0xc57   :  { %1992 = vsyncpa [#allocation8 + $0x1], 1 }

</bundles_post_ra>
